<compile_context>
chip_gen: v7x
topology: tpu7x:2x2x1
jax: 0.10.0
libtpu: 0.0.40
codegen_flags: <defaults>
</compile_context>

<pallas_src>
import functools

import jax
import jax.numpy as jnp
from jax import lax
from jax.experimental import pallas as pl
from jax.experimental.pallas import tpu as pltpu


# ----------------------------- Pallas kernel --------------------------------
def postagger_kernel(x_ref,      # [T*Bp, E]  bf16 : time-major embeddings (padded batch)
                     wih_ref,    # [E, 8H]    bf16 : input proj, both dirs, per-gate interleaved
                     whh_ref,    # [2H, 8H]   bf16 : hidden proj, block-diagonal, per-gate interleaved
                     b_ref,      # [1, 8H]    f32  : fused bias (b_ih + b_hh, both dirs)
                     wdf_ref,    # [H, L]     bf16 : dense rows for fwd hidden
                     wdb_ref,    # [H, L]     bf16 : dense rows for bwd hidden
                     bd_ref,     # [1, L]     f32  : dense bias
                     out_ref,    # [T*Bp, L]  f32  : log-probs, time-major rows
                     *, T, Bp):
    H2 = whh_ref.shape[0]            # 2H
    H = H2 // 2
    G = 4 * H2                       # 8H packed gate width

    # (1) Hoisted input projection + bias: ONE 2D MXU contraction, entirely
    #     off the serial recurrence path.
    gin = jnp.dot(x_ref[...], wih_ref[...],
                  preferred_element_type=jnp.float32) + b_ref[...]     # [T*Bp, 8H]
    gin3 = gin.reshape(T, Bp, G)

    # Lane mask: within each 2H-wide gate block, first H lanes = forward dir.
    lane = lax.broadcasted_iota(jnp.int32, (Bp, G), 1)
    is_fwd = (lane % H2) < H

    whh = whh_ref[...]               # loaded once, closed over by the unrolled loop

    # (2) Fused fwd+bwd recurrence, fully unrolled (T static).
    #     Carry: h = [h_f | h_b] (bf16, feeds MXU), c = [c_f | c_b] (f32).
    #     Gate columns: [i_f i_b | f_f f_b | g_f g_b | o_f o_b].
    #     g columns were pre-scaled by 2 at pack time, so the single sigmoid
    #     also yields tanh via 2*sigmoid(2x)-1.
    h_bf = jnp.zeros((Bp, H2), jnp.bfloat16)
    c = jnp.zeros((Bp, H2), jnp.float32)
    hf_list, hb_list = [], []
    for s in range(T):
        # fwd lanes use time s, bwd lanes use time T-1-s; the select depends
        # only on the hoisted projection, so it schedules off the serial path.
        gin_s = jnp.where(is_fwd, gin3[s], gin3[T - 1 - s])            # [Bp, 8H]
        gates = jnp.dot(h_bf, whh,
                        preferred_element_type=jnp.float32) + gin_s    # [Bp, 8H]
        sg = jax.nn.sigmoid(gates)                                     # one EUP pass
        i = sg[:, 0 * H2:1 * H2]
        f = sg[:, 1 * H2:2 * H2]
        g = 2.0 * sg[:, 2 * H2:3 * H2] - 1.0                           # tanh via VPU fma
        o = sg[:, 3 * H2:4 * H2]
        c = f * c + i * g
        h_f32 = o * jnp.tanh(c)                                        # [Bp, 2H] f32
        h_bf = h_f32.astype(jnp.bfloat16)                              # one pack per step
        hf_list.append(h_f32[:, :H])         # fwd hidden for time s
        hb_list.append(h_f32[:, H:])         # bwd hidden for time T-1-s

    # (3) Dense projection: two 2D contractions on the stacked hiddens
    #     (no VMEM scratch round-trip), then numerically-stable log-softmax.
    hf = jnp.concatenate(hf_list, axis=0).astype(jnp.bfloat16)         # [T*Bp, H]
    hb = jnp.concatenate(hb_list[::-1], axis=0).astype(jnp.bfloat16)   # time-aligned
    logits = (jnp.dot(hf, wdf_ref[...], preferred_element_type=jnp.float32)
              + jnp.dot(hb, wdb_ref[...], preferred_element_type=jnp.float32)
              + bd_ref[...])                                           # [T*Bp, L]
    m = jnp.max(logits, axis=-1, keepdims=True)
    lse = m + jnp.log(jnp.sum(jnp.exp(logits - m), axis=-1, keepdims=True))
    out_ref[...] = logits - lse


# --------------------------- parameter packing -------------------------------
def _interleave_gates(wf, wb):
    """[D,4H],[D,4H] -> [D,8H]; columns [i_f i_b | f_f f_b | g_f g_b | o_f o_b]."""
    H = wf.shape[1] // 4
    cols = []
    for gi in range(4):
        cols.append(wf[:, gi * H:(gi + 1) * H])
        cols.append(wb[:, gi * H:(gi + 1) * H])
    return jnp.concatenate(cols, axis=1)


def _blockdiag_gates(wf, wb):
    """[H,4H],[H,4H] -> [2H,8H] block-diagonal, per-gate interleaved columns."""
    Df, Db = wf.shape[0], wb.shape[0]
    H = wf.shape[1] // 4
    cols = []
    for gi in range(4):
        cols.append(jnp.concatenate(
            [wf[:, gi * H:(gi + 1) * H], jnp.zeros((Db, H), wf.dtype)], axis=0))
        cols.append(jnp.concatenate(
            [jnp.zeros((Df, H), wb.dtype), wb[:, gi * H:(gi + 1) * H]], axis=0))
    return jnp.concatenate(cols, axis=1)


def _scale_g_cols(w, H):
    """Pre-scale the g-gate columns (block [4H:6H] of the 8H axis) by 2 so the
    kernel can use tanh(x) = 2*sigmoid(2x) - 1."""
    H2 = 2 * H
    return w.at[:, 2 * H2:3 * H2].multiply(2.0)


def pack_params(params):
    """One-time packing of LSTM / dense weights into the fused kernel layout.
    Matmul operands go to bf16 (MXU-native on v6e/v7x); biases stay f32."""
    H = params['whh_f'].shape[0]
    wih = _interleave_gates(params['wih_f'], params['wih_b'])   # [E, 8H], no zeros
    whh = _blockdiag_gates(params['whh_f'], params['whh_b'])    # [2H, 8H]
    b = _interleave_gates(params['b_f'], params['b_b'])         # [1, 8H]
    wih = _scale_g_cols(wih, H)
    whh = _scale_g_cols(whh, H)
    b = _scale_g_cols(b, H)
    return {
        'emb_table': params['emb_table'].astype(jnp.float32),
        'wih': wih.astype(jnp.bfloat16),
        'whh': whh.astype(jnp.bfloat16),
        'b':   b.astype(jnp.float32),
        'wd_f': params['wd'][:H].astype(jnp.bfloat16),
        'wd_b': params['wd'][H:].astype(jnp.bfloat16),
        'bd':   params['bd'].astype(jnp.float32),
    }


# ------------------------------ JAX wrapper ----------------------------------
@jax.jit
def pos_tagger_forward(word_ids, packed):
    """word_ids: [B, T] int32  ->  log_probs: [B, T, L] float32."""
    B, T = word_ids.shape
    Bp = ((B + 7) // 8) * 8                       # pad batch to a full sublane tile
    emb = packed['emb_table'][word_ids]           # [B, T, E] f32 (gather stays in JAX)
    E = emb.shape[-1]
    L = packed['bd'].shape[-1]

    emb_p = jnp.pad(emb, ((0, Bp - B), (0, 0), (0, 0)))            # [Bp, T, E]
    x2d = (jnp.transpose(emb_p, (1, 0, 2))                         # time-major rows
           .reshape(T * Bp, E).astype(jnp.bfloat16))               # [T*Bp, E]

    vmem = pl.BlockSpec(memory_space=pltpu.MemorySpace.VMEM)
    out2d = pl.pallas_call(
        functools.partial(postagger_kernel, T=T, Bp=Bp),
        out_shape=jax.ShapeDtypeStruct((T * Bp, L), jnp.float32),
        in_specs=[vmem] * 7,
        out_specs=vmem,
    )(x2d, packed['wih'], packed['whh'], packed['b'],
      packed['wd_f'], packed['wd_b'], packed['bd'])

    # [T*Bp, L] -> [Bp, T, L]; drop the padded batch rows.
    return jnp.transpose(out2d.reshape(T, Bp, L), (1, 0, 2))[:B]


# --------------------------- pure-JAX reference -------------------------------
def pos_tagger_reference(word_ids, params):
    emb = params['emb_table'][word_ids].astype(jnp.float32)         # [B, T, E]
    H = params['whh_f'].shape[0]

    def run_dir(x_tm, wih, whh, b):                                 # x_tm: [T,B,E]
        def step(carry, x):
            h, c = carry
            gates = x @ wih + h @ whh + b
            i = jax.nn.sigmoid(gates[:, 0 * H:1 * H])
            f = jax.nn.sigmoid(gates[:, 1 * H:2 * H])
            g = jnp.tanh(gates[:, 2 * H:3 * H])
            o = jax.nn.sigmoid(gates[:, 3 * H:4 * H])
            c = f * c + i * g
            h = o * jnp.tanh(c)
            return (h, c), h
        B = x_tm.shape[1]
        z = jnp.zeros((B, H), jnp.float32)
        _, hs = lax.scan(step, (z, z), x_tm)
        return hs                                                   # [T, B, H]

    x_tm = jnp.transpose(emb, (1, 0, 2))
    hf = run_dir(x_tm, params['wih_f'], params['whh_f'], params['b_f'])
    hb = run_dir(x_tm[::-1], params['wih_b'], params['whh_b'], params['b_b'])[::-1]
    hcat = jnp.concatenate([hf, hb], axis=-1)                       # [T, B, 2H]
    logits = jnp.einsum('tbh,hl->tbl', hcat, params['wd']) + params['bd']
    log_probs = logits - jax.scipy.special.logsumexp(logits, axis=-1,
                                                     keepdims=True)
    return jnp.transpose(log_probs, (1, 0, 2))


# ------------------------------- main ----------------------------------------
if __name__ == "__main__":
    # Small shapes consistent with the module's forward.
    B, T = 2, 8
    VOCAB = 50
    E = 32          # word_embedding_dim
    H = 32          # hidden_dim
    L = 16          # labels_number

    key = jax.random.PRNGKey(0)
    ks = jax.random.split(key, 12)

    def uni(k, shape, scale):
        return jax.random.uniform(k, shape, jnp.float32, -scale, scale)

    # nn.Embedding(padding_idx=0): row 0 is zeros
    emb_table = jax.random.normal(ks[0], (VOCAB, E), jnp.float32)
    emb_table = emb_table.at[0].set(0.0)

    s_lstm = 1.0 / jnp.sqrt(H)
    params = {
        'emb_table': emb_table,
        # forward-direction LSTM (stored pre-transposed: [in, 4H], gate order i,f,g,o)
        'wih_f': uni(ks[1], (E, 4 * H), s_lstm),
        'whh_f': uni(ks[2], (H, 4 * H), s_lstm),
        'b_f':   uni(ks[3], (1, 4 * H), s_lstm) + uni(ks[4], (1, 4 * H), s_lstm),
        # backward-direction LSTM
        'wih_b': uni(ks[5], (E, 4 * H), s_lstm),
        'whh_b': uni(ks[6], (H, 4 * H), s_lstm),
        'b_b':   uni(ks[7], (1, 4 * H), s_lstm) + uni(ks[8], (1, 4 * H), s_lstm),
        # dense: nn.Linear(2H, L)  (stored as [2H, L])
        'wd': uni(ks[9], (2 * H, L), 1.0 / jnp.sqrt(2 * H)),
        'bd': uni(ks[10], (1, L), 1.0 / jnp.sqrt(2 * H)),
    }

    word_ids = jax.random.randint(ks[11], (B, T), 0, VOCAB, dtype=jnp.int32)

    packed = pack_params(params)                     # one-time weight packing
    log_probs = pos_tagger_forward(word_ids, packed)
    log_probs = jax.block_until_ready(log_probs)

    ref = pos_tagger_reference(word_ids, params)     # f32 reference
    assert log_probs.shape == (B, T, L)
    # each row must be a valid log-distribution (exact regardless of bf16 weights)
    assert jnp.allclose(jnp.sum(jnp.exp(log_probs), axis=-1), 1.0, atol=1e-3)
    # bf16 weights vs f32 reference -> modest tolerance
    assert jnp.allclose(log_probs, ref, atol=3e-2, rtol=2e-2), "mismatch vs reference"

    # TODO(synk): char-LSTM branch (use_char_ids=True) and CrossEntropy loss
    # branch (labels is not None) are not exercised; dropout=0.0 is identity.
    print("KERNEL_OK")
</pallas_src>

<mosaic_0001>
module attributes {stable_mosaic.version = 11 : i64} {
  func.func @postagger_kernel(%arg0: memref<64x32xbf16, #tpu.memory_space<vmem>>, %arg1: memref<32x256xbf16, #tpu.memory_space<vmem>>, %arg2: memref<64x256xbf16, #tpu.memory_space<vmem>>, %arg3: memref<1x256xf32, #tpu.memory_space<vmem>>, %arg4: memref<32x16xbf16, #tpu.memory_space<vmem>>, %arg5: memref<32x16xbf16, #tpu.memory_space<vmem>>, %arg6: memref<1x16xf32, #tpu.memory_space<vmem>>, %arg7: memref<64x16xf32, #tpu.memory_space<vmem>>) attributes {dimension_semantics = [], scalar_prefetch = 0 : i64, scratch_operands = 0 : i64, tpu.core_type = #tpu.core_type<tc>} {
    %c0 = arith.constant 0 : index
    %c0_0 = arith.constant 0 : index
    %0 = vector.load %arg0[%c0, %c0_0] : memref<64x32xbf16, #tpu.memory_space<vmem>>, vector<64x32xbf16>
    %c0_1 = arith.constant 0 : index
    %c0_2 = arith.constant 0 : index
    %1 = vector.load %arg1[%c0_1, %c0_2] : memref<32x256xbf16, #tpu.memory_space<vmem>>, vector<32x256xbf16>
    %cst = arith.constant dense<0.000000e+00> : vector<64x256xf32>
    %2 = tpu.matmul %0, %1, %cst {dimension_numbers = #tpu.dot_dimension_numbers<[1], [0], [0], [1], [0, 0, 1, 1], [], []>} : vector<64x32xbf16>, vector<32x256xbf16>, vector<64x256xf32> -> vector<64x256xf32>
    %c0_3 = arith.constant 0 : index
    %c0_4 = arith.constant 0 : index
    %3 = vector.load %arg3[%c0_3, %c0_4] : memref<1x256xf32, #tpu.memory_space<vmem>>, vector<1x256xf32>
    %4 = vector.broadcast %3 : vector<1x256xf32> to vector<64x256xf32>
    %5 = arith.addf %2, %4 : vector<64x256xf32>
    %6 = vector.shape_cast %5 : vector<64x256xf32> to vector<8x8x256xf32>
    %7 = tpu.iota {dimensions = array<i32: 1>} : vector<8x256xi32>
    %c64_i32 = arith.constant 64 : i32
    %c0_i32 = arith.constant 0 : i32
    %8 = arith.cmpi eq, %c64_i32, %c0_i32 : i32
    %c1_i32 = arith.constant 1 : i32
    %9 = arith.select %8, %c1_i32, %c64_i32 : i32
    %10 = vector.broadcast %9 : i32 to vector<8x256xi32>
    %11 = arith.remsi %7, %10 : vector<8x256xi32>
    %c0_i32_5 = arith.constant 0 : i32
    %12 = vector.broadcast %c0_i32_5 : i32 to vector<8x256xi32>
    %13 = arith.cmpi ne, %11, %12 : vector<8x256xi32>
    %c0_i32_6 = arith.constant 0 : i32
    %14 = vector.broadcast %c0_i32_6 : i32 to vector<8x256xi32>
    %15 = arith.cmpi slt, %11, %14 : vector<8x256xi32>
    %c0_i32_7 = arith.constant 0 : i32
    %16 = arith.cmpi slt, %9, %c0_i32_7 : i32
    %17 = vector.broadcast %16 : i1 to vector<8x256xi1>
    %18 = vector.broadcast %17 : vector<8x256xi1> to vector<8x256xi1>
    %19 = arith.xori %15, %18 : vector<8x256xi1>
    %20 = arith.andi %19, %13 : vector<8x256xi1>
    %21 = vector.broadcast %9 : i32 to vector<8x256xi32>
    %22 = arith.addi %11, %21 : vector<8x256xi32>
    %23 = arith.select %20, %22, %11 : vector<8x256xi1>, vector<8x256xi32>
    %c32_i32 = arith.constant 32 : i32
    %24 = vector.broadcast %c32_i32 : i32 to vector<8x256xi32>
    %25 = arith.cmpi slt, %23, %24 : vector<8x256xi32>
    %c0_8 = arith.constant 0 : index
    %c0_9 = arith.constant 0 : index
    %26 = vector.load %arg2[%c0_8, %c0_9] : memref<64x256xbf16, #tpu.memory_space<vmem>>, vector<64x256xbf16>
    %cst_10 = arith.constant 0.000000e+00 : bf16
    %27 = vector.broadcast %cst_10 : bf16 to vector<8x64xbf16>
    %cst_11 = arith.constant 0.000000e+00 : f32
    %28 = vector.broadcast %cst_11 : f32 to vector<8x64xf32>
    %29 = vector.extract_strided_slice %6 {offsets = [0, 0, 0], sizes = [1, 8, 256], strides = [1, 1, 1]} : vector<8x8x256xf32> to vector<1x8x256xf32>
    %30 = vector.shape_cast %29 : vector<1x8x256xf32> to vector<8x256xf32>
    %31 = vector.extract_strided_slice %6 {offsets = [7, 0, 0], sizes = [1, 8, 256], strides = [1, 1, 1]} : vector<8x8x256xf32> to vector<1x8x256xf32>
    %32 = vector.shape_cast %31 : vector<1x8x256xf32> to vector<8x256xf32>
    %33 = arith.select %25, %30, %32 : vector<8x256xi1>, vector<8x256xf32>
    %cst_12 = arith.constant dense<0.000000e+00> : vector<8x256xf32>
    %34 = tpu.matmul %27, %26, %cst_12 {dimension_numbers = #tpu.dot_dimension_numbers<[1], [0], [0], [1], [0, 0, 1, 1], [], []>} : vector<8x64xbf16>, vector<64x256xbf16>, vector<8x256xf32> -> vector<8x256xf32>
    %35 = arith.addf %34, %33 : vector<8x256xf32>
    %36 = arith.negf %35 : vector<8x256xf32>
    %37 = math.exp %36 : vector<8x256xf32>
    %cst_13 = arith.constant 1.000000e+00 : f32
    %38 = vector.broadcast %cst_13 : f32 to vector<8x256xf32>
    %39 = arith.addf %38, %37 : vector<8x256xf32>
    %40 = arith.divf %38, %39 : vector<8x256xf32>
    %41 = vector.extract_strided_slice %40 {offsets = [0, 0], sizes = [8, 64], strides = [1, 1]} : vector<8x256xf32> to vector<8x64xf32>
    %42 = vector.extract_strided_slice %40 {offsets = [0, 64], sizes = [8, 64], strides = [1, 1]} : vector<8x256xf32> to vector<8x64xf32>
    %43 = vector.extract_strided_slice %40 {offsets = [0, 128], sizes = [8, 64], strides = [1, 1]} : vector<8x256xf32> to vector<8x64xf32>
    %cst_14 = arith.constant 2.000000e+00 : f32
    %44 = vector.broadcast %cst_14 : f32 to vector<8x64xf32>
    %45 = arith.mulf %44, %43 : vector<8x64xf32>
    %cst_15 = arith.constant 1.000000e+00 : f32
    %46 = vector.broadcast %cst_15 : f32 to vector<8x64xf32>
    %47 = arith.subf %45, %46 : vector<8x64xf32>
    %48 = vector.extract_strided_slice %40 {offsets = [0, 192], sizes = [8, 64], strides = [1, 1]} : vector<8x256xf32> to vector<8x64xf32>
    %49 = arith.mulf %42, %28 : vector<8x64xf32>
    %50 = arith.mulf %41, %47 : vector<8x64xf32>
    %51 = arith.addf %49, %50 : vector<8x64xf32>
    %52 = math.tanh %51 : vector<8x64xf32>
    %53 = arith.mulf %48, %52 : vector<8x64xf32>
    %54 = arith.truncf %53 : vector<8x64xf32> to vector<8x64xbf16>
    %55 = vector.extract_strided_slice %53 {offsets = [0, 0], sizes = [8, 32], strides = [1, 1]} : vector<8x64xf32> to vector<8x32xf32>
    %56 = vector.extract_strided_slice %53 {offsets = [0, 32], sizes = [8, 32], strides = [1, 1]} : vector<8x64xf32> to vector<8x32xf32>
    %57 = vector.extract_strided_slice %6 {offsets = [1, 0, 0], sizes = [1, 8, 256], strides = [1, 1, 1]} : vector<8x8x256xf32> to vector<1x8x256xf32>
    %58 = vector.shape_cast %57 : vector<1x8x256xf32> to vector<8x256xf32>
    %59 = vector.extract_strided_slice %6 {offsets = [6, 0, 0], sizes = [1, 8, 256], strides = [1, 1, 1]} : vector<8x8x256xf32> to vector<1x8x256xf32>
    %60 = vector.shape_cast %59 : vector<1x8x256xf32> to vector<8x256xf32>
    %61 = arith.select %25, %58, %60 : vector<8x256xi1>, vector<8x256xf32>
    %cst_16 = arith.constant dense<0.000000e+00> : vector<8x256xf32>
    %62 = tpu.matmul %54, %26, %cst_16 {dimension_numbers = #tpu.dot_dimension_numbers<[1], [0], [0], [1], [0, 0, 1, 1], [], []>} : vector<8x64xbf16>, vector<64x256xbf16>, vector<8x256xf32> -> vector<8x256xf32>
    %63 = arith.addf %62, %61 : vector<8x256xf32>
    %64 = arith.negf %63 : vector<8x256xf32>
    %65 = math.exp %64 : vector<8x256xf32>
    %cst_17 = arith.constant 1.000000e+00 : f32
    %66 = vector.broadcast %cst_17 : f32 to vector<8x256xf32>
    %67 = arith.addf %66, %65 : vector<8x256xf32>
    %68 = arith.divf %66, %67 : vector<8x256xf32>
    %69 = vector.extract_strided_slice %68 {offsets = [0, 0], sizes = [8, 64], strides = [1, 1]} : vector<8x256xf32> to vector<8x64xf32>
    %70 = vector.extract_strided_slice %68 {offsets = [0, 64], sizes = [8, 64], strides = [1, 1]} : vector<8x256xf32> to vector<8x64xf32>
    %71 = vector.extract_strided_slice %68 {offsets = [0, 128], sizes = [8, 64], strides = [1, 1]} : vector<8x256xf32> to vector<8x64xf32>
    %cst_18 = arith.constant 2.000000e+00 : f32
    %72 = vector.broadcast %cst_18 : f32 to vector<8x64xf32>
    %73 = arith.mulf %72, %71 : vector<8x64xf32>
    %cst_19 = arith.constant 1.000000e+00 : f32
    %74 = vector.broadcast %cst_19 : f32 to vector<8x64xf32>
    %75 = arith.subf %73, %74 : vector<8x64xf32>
    %76 = vector.extract_strided_slice %68 {offsets = [0, 192], sizes = [8, 64], strides = [1, 1]} : vector<8x256xf32> to vector<8x64xf32>
    %77 = arith.mulf %70, %51 : vector<8x64xf32>
    %78 = arith.mulf %69, %75 : vector<8x64xf32>
    %79 = arith.addf %77, %78 : vector<8x64xf32>
    %80 = math.tanh %79 : vector<8x64xf32>
    %81 = arith.mulf %76, %80 : vector<8x64xf32>
    %82 = arith.truncf %81 : vector<8x64xf32> to vector<8x64xbf16>
    %83 = vector.extract_strided_slice %81 {offsets = [0, 0], sizes = [8, 32], strides = [1, 1]} : vector<8x64xf32> to vector<8x32xf32>
    %84 = vector.extract_strided_slice %81 {offsets = [0, 32], sizes = [8, 32], strides = [1, 1]} : vector<8x64xf32> to vector<8x32xf32>
    %85 = vector.extract_strided_slice %6 {offsets = [2, 0, 0], sizes = [1, 8, 256], strides = [1, 1, 1]} : vector<8x8x256xf32> to vector<1x8x256xf32>
    %86 = vector.shape_cast %85 : vector<1x8x256xf32> to vector<8x256xf32>
    %87 = vector.extract_strided_slice %6 {offsets = [5, 0, 0], sizes = [1, 8, 256], strides = [1, 1, 1]} : vector<8x8x256xf32> to vector<1x8x256xf32>
    %88 = vector.shape_cast %87 : vector<1x8x256xf32> to vector<8x256xf32>
    %89 = arith.select %25, %86, %88 : vector<8x256xi1>, vector<8x256xf32>
    %cst_20 = arith.constant dense<0.000000e+00> : vector<8x256xf32>
    %90 = tpu.matmul %82, %26, %cst_20 {dimension_numbers = #tpu.dot_dimension_numbers<[1], [0], [0], [1], [0, 0, 1, 1], [], []>} : vector<8x64xbf16>, vector<64x256xbf16>, vector<8x256xf32> -> vector<8x256xf32>
    %91 = arith.addf %90, %89 : vector<8x256xf32>
    %92 = arith.negf %91 : vector<8x256xf32>
    %93 = math.exp %92 : vector<8x256xf32>
    %cst_21 = arith.constant 1.000000e+00 : f32
    %94 = vector.broadcast %cst_21 : f32 to vector<8x256xf32>
    %95 = arith.addf %94, %93 : vector<8x256xf32>
    %96 = arith.divf %94, %95 : vector<8x256xf32>
    %97 = vector.extract_strided_slice %96 {offsets = [0, 0], sizes = [8, 64], strides = [1, 1]} : vector<8x256xf32> to vector<8x64xf32>
    %98 = vector.extract_strided_slice %96 {offsets = [0, 64], sizes = [8, 64], strides = [1, 1]} : vector<8x256xf32> to vector<8x64xf32>
    %99 = vector.extract_strided_slice %96 {offsets = [0, 128], sizes = [8, 64], strides = [1, 1]} : vector<8x256xf32> to vector<8x64xf32>
    %cst_22 = arith.constant 2.000000e+00 : f32
    %100 = vector.broadcast %cst_22 : f32 to vector<8x64xf32>
    %101 = arith.mulf %100, %99 : vector<8x64xf32>
    %cst_23 = arith.constant 1.000000e+00 : f32
    %102 = vector.broadcast %cst_23 : f32 to vector<8x64xf32>
    %103 = arith.subf %101, %102 : vector<8x64xf32>
    %104 = vector.extract_strided_slice %96 {offsets = [0, 192], sizes = [8, 64], strides = [1, 1]} : vector<8x256xf32> to vector<8x64xf32>
    %105 = arith.mulf %98, %79 : vector<8x64xf32>
    %106 = arith.mulf %97, %103 : vector<8x64xf32>
    %107 = arith.addf %105, %106 : vector<8x64xf32>
    %108 = math.tanh %107 : vector<8x64xf32>
    %109 = arith.mulf %104, %108 : vector<8x64xf32>
    %110 = arith.truncf %109 : vector<8x64xf32> to vector<8x64xbf16>
    %111 = vector.extract_strided_slice %109 {offsets = [0, 0], sizes = [8, 32], strides = [1, 1]} : vector<8x64xf32> to vector<8x32xf32>
    %112 = vector.extract_strided_slice %109 {offsets = [0, 32], sizes = [8, 32], strides = [1, 1]} : vector<8x64xf32> to vector<8x32xf32>
    %113 = vector.extract_strided_slice %6 {offsets = [3, 0, 0], sizes = [1, 8, 256], strides = [1, 1, 1]} : vector<8x8x256xf32> to vector<1x8x256xf32>
    %114 = vector.shape_cast %113 : vector<1x8x256xf32> to vector<8x256xf32>
    %115 = vector.extract_strided_slice %6 {offsets = [4, 0, 0], sizes = [1, 8, 256], strides = [1, 1, 1]} : vector<8x8x256xf32> to vector<1x8x256xf32>
    %116 = vector.shape_cast %115 : vector<1x8x256xf32> to vector<8x256xf32>
    %117 = arith.select %25, %114, %116 : vector<8x256xi1>, vector<8x256xf32>
    %cst_24 = arith.constant dense<0.000000e+00> : vector<8x256xf32>
    %118 = tpu.matmul %110, %26, %cst_24 {dimension_numbers = #tpu.dot_dimension_numbers<[1], [0], [0], [1], [0, 0, 1, 1], [], []>} : vector<8x64xbf16>, vector<64x256xbf16>, vector<8x256xf32> -> vector<8x256xf32>
    %119 = arith.addf %118, %117 : vector<8x256xf32>
    %120 = arith.negf %119 : vector<8x256xf32>
    %121 = math.exp %120 : vector<8x256xf32>
    %cst_25 = arith.constant 1.000000e+00 : f32
    %122 = vector.broadcast %cst_25 : f32 to vector<8x256xf32>
    %123 = arith.addf %122, %121 : vector<8x256xf32>
    %124 = arith.divf %122, %123 : vector<8x256xf32>
    %125 = vector.extract_strided_slice %124 {offsets = [0, 0], sizes = [8, 64], strides = [1, 1]} : vector<8x256xf32> to vector<8x64xf32>
    %126 = vector.extract_strided_slice %124 {offsets = [0, 64], sizes = [8, 64], strides = [1, 1]} : vector<8x256xf32> to vector<8x64xf32>
    %127 = vector.extract_strided_slice %124 {offsets = [0, 128], sizes = [8, 64], strides = [1, 1]} : vector<8x256xf32> to vector<8x64xf32>
    %cst_26 = arith.constant 2.000000e+00 : f32
    %128 = vector.broadcast %cst_26 : f32 to vector<8x64xf32>
    %129 = arith.mulf %128, %127 : vector<8x64xf32>
    %cst_27 = arith.constant 1.000000e+00 : f32
    %130 = vector.broadcast %cst_27 : f32 to vector<8x64xf32>
    %131 = arith.subf %129, %130 : vector<8x64xf32>
    %132 = vector.extract_strided_slice %124 {offsets = [0, 192], sizes = [8, 64], strides = [1, 1]} : vector<8x256xf32> to vector<8x64xf32>
    %133 = arith.mulf %126, %107 : vector<8x64xf32>
    %134 = arith.mulf %125, %131 : vector<8x64xf32>
    %135 = arith.addf %133, %134 : vector<8x64xf32>
    %136 = math.tanh %135 : vector<8x64xf32>
    %137 = arith.mulf %132, %136 : vector<8x64xf32>
    %138 = arith.truncf %137 : vector<8x64xf32> to vector<8x64xbf16>
    %139 = vector.extract_strided_slice %137 {offsets = [0, 0], sizes = [8, 32], strides = [1, 1]} : vector<8x64xf32> to vector<8x32xf32>
    %140 = vector.extract_strided_slice %137 {offsets = [0, 32], sizes = [8, 32], strides = [1, 1]} : vector<8x64xf32> to vector<8x32xf32>
    %141 = vector.extract_strided_slice %6 {offsets = [4, 0, 0], sizes = [1, 8, 256], strides = [1, 1, 1]} : vector<8x8x256xf32> to vector<1x8x256xf32>
    %142 = vector.shape_cast %141 : vector<1x8x256xf32> to vector<8x256xf32>
    %143 = vector.extract_strided_slice %6 {offsets = [3, 0, 0], sizes = [1, 8, 256], strides = [1, 1, 1]} : vector<8x8x256xf32> to vector<1x8x256xf32>
    %144 = vector.shape_cast %143 : vector<1x8x256xf32> to vector<8x256xf32>
    %145 = arith.select %25, %142, %144 : vector<8x256xi1>, vector<8x256xf32>
    %cst_28 = arith.constant dense<0.000000e+00> : vector<8x256xf32>
    %146 = tpu.matmul %138, %26, %cst_28 {dimension_numbers = #tpu.dot_dimension_numbers<[1], [0], [0], [1], [0, 0, 1, 1], [], []>} : vector<8x64xbf16>, vector<64x256xbf16>, vector<8x256xf32> -> vector<8x256xf32>
    %147 = arith.addf %146, %145 : vector<8x256xf32>
    %148 = arith.negf %147 : vector<8x256xf32>
    %149 = math.exp %148 : vector<8x256xf32>
    %cst_29 = arith.constant 1.000000e+00 : f32
    %150 = vector.broadcast %cst_29 : f32 to vector<8x256xf32>
    %151 = arith.addf %150, %149 : vector<8x256xf32>
    %152 = arith.divf %150, %151 : vector<8x256xf32>
    %153 = vector.extract_strided_slice %152 {offsets = [0, 0], sizes = [8, 64], strides = [1, 1]} : vector<8x256xf32> to vector<8x64xf32>
    %154 = vector.extract_strided_slice %152 {offsets = [0, 64], sizes = [8, 64], strides = [1, 1]} : vector<8x256xf32> to vector<8x64xf32>
    %155 = vector.extract_strided_slice %152 {offsets = [0, 128], sizes = [8, 64], strides = [1, 1]} : vector<8x256xf32> to vector<8x64xf32>
    %cst_30 = arith.constant 2.000000e+00 : f32
    %156 = vector.broadcast %cst_30 : f32 to vector<8x64xf32>
    %157 = arith.mulf %156, %155 : vector<8x64xf32>
    %cst_31 = arith.constant 1.000000e+00 : f32
    %158 = vector.broadcast %cst_31 : f32 to vector<8x64xf32>
    %159 = arith.subf %157, %158 : vector<8x64xf32>
    %160 = vector.extract_strided_slice %152 {offsets = [0, 192], sizes = [8, 64], strides = [1, 1]} : vector<8x256xf32> to vector<8x64xf32>
    %161 = arith.mulf %154, %135 : vector<8x64xf32>
    %162 = arith.mulf %153, %159 : vector<8x64xf32>
    %163 = arith.addf %161, %162 : vector<8x64xf32>
    %164 = math.tanh %163 : vector<8x64xf32>
    %165 = arith.mulf %160, %164 : vector<8x64xf32>
    %166 = arith.truncf %165 : vector<8x64xf32> to vector<8x64xbf16>
    %167 = vector.extract_strided_slice %165 {offsets = [0, 0], sizes = [8, 32], strides = [1, 1]} : vector<8x64xf32> to vector<8x32xf32>
    %168 = vector.extract_strided_slice %165 {offsets = [0, 32], sizes = [8, 32], strides = [1, 1]} : vector<8x64xf32> to vector<8x32xf32>
    %169 = vector.extract_strided_slice %6 {offsets = [5, 0, 0], sizes = [1, 8, 256], strides = [1, 1, 1]} : vector<8x8x256xf32> to vector<1x8x256xf32>
    %170 = vector.shape_cast %169 : vector<1x8x256xf32> to vector<8x256xf32>
    %171 = vector.extract_strided_slice %6 {offsets = [2, 0, 0], sizes = [1, 8, 256], strides = [1, 1, 1]} : vector<8x8x256xf32> to vector<1x8x256xf32>
    %172 = vector.shape_cast %171 : vector<1x8x256xf32> to vector<8x256xf32>
    %173 = arith.select %25, %170, %172 : vector<8x256xi1>, vector<8x256xf32>
    %cst_32 = arith.constant dense<0.000000e+00> : vector<8x256xf32>
    %174 = tpu.matmul %166, %26, %cst_32 {dimension_numbers = #tpu.dot_dimension_numbers<[1], [0], [0], [1], [0, 0, 1, 1], [], []>} : vector<8x64xbf16>, vector<64x256xbf16>, vector<8x256xf32> -> vector<8x256xf32>
    %175 = arith.addf %174, %173 : vector<8x256xf32>
    %176 = arith.negf %175 : vector<8x256xf32>
    %177 = math.exp %176 : vector<8x256xf32>
    %cst_33 = arith.constant 1.000000e+00 : f32
    %178 = vector.broadcast %cst_33 : f32 to vector<8x256xf32>
    %179 = arith.addf %178, %177 : vector<8x256xf32>
    %180 = arith.divf %178, %179 : vector<8x256xf32>
    %181 = vector.extract_strided_slice %180 {offsets = [0, 0], sizes = [8, 64], strides = [1, 1]} : vector<8x256xf32> to vector<8x64xf32>
    %182 = vector.extract_strided_slice %180 {offsets = [0, 64], sizes = [8, 64], strides = [1, 1]} : vector<8x256xf32> to vector<8x64xf32>
    %183 = vector.extract_strided_slice %180 {offsets = [0, 128], sizes = [8, 64], strides = [1, 1]} : vector<8x256xf32> to vector<8x64xf32>
    %cst_34 = arith.constant 2.000000e+00 : f32
    %184 = vector.broadcast %cst_34 : f32 to vector<8x64xf32>
    %185 = arith.mulf %184, %183 : vector<8x64xf32>
    %cst_35 = arith.constant 1.000000e+00 : f32
    %186 = vector.broadcast %cst_35 : f32 to vector<8x64xf32>
    %187 = arith.subf %185, %186 : vector<8x64xf32>
    %188 = vector.extract_strided_slice %180 {offsets = [0, 192], sizes = [8, 64], strides = [1, 1]} : vector<8x256xf32> to vector<8x64xf32>
    %189 = arith.mulf %182, %163 : vector<8x64xf32>
    %190 = arith.mulf %181, %187 : vector<8x64xf32>
    %191 = arith.addf %189, %190 : vector<8x64xf32>
    %192 = math.tanh %191 : vector<8x64xf32>
    %193 = arith.mulf %188, %192 : vector<8x64xf32>
    %194 = arith.truncf %193 : vector<8x64xf32> to vector<8x64xbf16>
    %195 = vector.extract_strided_slice %193 {offsets = [0, 0], sizes = [8, 32], strides = [1, 1]} : vector<8x64xf32> to vector<8x32xf32>
    %196 = vector.extract_strided_slice %193 {offsets = [0, 32], sizes = [8, 32], strides = [1, 1]} : vector<8x64xf32> to vector<8x32xf32>
    %197 = vector.extract_strided_slice %6 {offsets = [6, 0, 0], sizes = [1, 8, 256], strides = [1, 1, 1]} : vector<8x8x256xf32> to vector<1x8x256xf32>
    %198 = vector.shape_cast %197 : vector<1x8x256xf32> to vector<8x256xf32>
    %199 = vector.extract_strided_slice %6 {offsets = [1, 0, 0], sizes = [1, 8, 256], strides = [1, 1, 1]} : vector<8x8x256xf32> to vector<1x8x256xf32>
    %200 = vector.shape_cast %199 : vector<1x8x256xf32> to vector<8x256xf32>
    %201 = arith.select %25, %198, %200 : vector<8x256xi1>, vector<8x256xf32>
    %cst_36 = arith.constant dense<0.000000e+00> : vector<8x256xf32>
    %202 = tpu.matmul %194, %26, %cst_36 {dimension_numbers = #tpu.dot_dimension_numbers<[1], [0], [0], [1], [0, 0, 1, 1], [], []>} : vector<8x64xbf16>, vector<64x256xbf16>, vector<8x256xf32> -> vector<8x256xf32>
    %203 = arith.addf %202, %201 : vector<8x256xf32>
    %204 = arith.negf %203 : vector<8x256xf32>
    %205 = math.exp %204 : vector<8x256xf32>
    %cst_37 = arith.constant 1.000000e+00 : f32
    %206 = vector.broadcast %cst_37 : f32 to vector<8x256xf32>
    %207 = arith.addf %206, %205 : vector<8x256xf32>
    %208 = arith.divf %206, %207 : vector<8x256xf32>
    %209 = vector.extract_strided_slice %208 {offsets = [0, 0], sizes = [8, 64], strides = [1, 1]} : vector<8x256xf32> to vector<8x64xf32>
    %210 = vector.extract_strided_slice %208 {offsets = [0, 64], sizes = [8, 64], strides = [1, 1]} : vector<8x256xf32> to vector<8x64xf32>
    %211 = vector.extract_strided_slice %208 {offsets = [0, 128], sizes = [8, 64], strides = [1, 1]} : vector<8x256xf32> to vector<8x64xf32>
    %cst_38 = arith.constant 2.000000e+00 : f32
    %212 = vector.broadcast %cst_38 : f32 to vector<8x64xf32>
    %213 = arith.mulf %212, %211 : vector<8x64xf32>
    %cst_39 = arith.constant 1.000000e+00 : f32
    %214 = vector.broadcast %cst_39 : f32 to vector<8x64xf32>
    %215 = arith.subf %213, %214 : vector<8x64xf32>
    %216 = vector.extract_strided_slice %208 {offsets = [0, 192], sizes = [8, 64], strides = [1, 1]} : vector<8x256xf32> to vector<8x64xf32>
    %217 = arith.mulf %210, %191 : vector<8x64xf32>
    %218 = arith.mulf %209, %215 : vector<8x64xf32>
    %219 = arith.addf %217, %218 : vector<8x64xf32>
    %220 = math.tanh %219 : vector<8x64xf32>
    %221 = arith.mulf %216, %220 : vector<8x64xf32>
    %222 = arith.truncf %221 : vector<8x64xf32> to vector<8x64xbf16>
    %223 = vector.extract_strided_slice %221 {offsets = [0, 0], sizes = [8, 32], strides = [1, 1]} : vector<8x64xf32> to vector<8x32xf32>
    %224 = vector.extract_strided_slice %221 {offsets = [0, 32], sizes = [8, 32], strides = [1, 1]} : vector<8x64xf32> to vector<8x32xf32>
    %225 = vector.extract_strided_slice %6 {offsets = [7, 0, 0], sizes = [1, 8, 256], strides = [1, 1, 1]} : vector<8x8x256xf32> to vector<1x8x256xf32>
    %226 = vector.shape_cast %225 : vector<1x8x256xf32> to vector<8x256xf32>
    %227 = vector.extract_strided_slice %6 {offsets = [0, 0, 0], sizes = [1, 8, 256], strides = [1, 1, 1]} : vector<8x8x256xf32> to vector<1x8x256xf32>
    %228 = vector.shape_cast %227 : vector<1x8x256xf32> to vector<8x256xf32>
    %229 = arith.select %25, %226, %228 : vector<8x256xi1>, vector<8x256xf32>
    %cst_40 = arith.constant dense<0.000000e+00> : vector<8x256xf32>
    %230 = tpu.matmul %222, %26, %cst_40 {dimension_numbers = #tpu.dot_dimension_numbers<[1], [0], [0], [1], [0, 0, 1, 1], [], []>} : vector<8x64xbf16>, vector<64x256xbf16>, vector<8x256xf32> -> vector<8x256xf32>
    %231 = arith.addf %230, %229 : vector<8x256xf32>
    %232 = arith.negf %231 : vector<8x256xf32>
    %233 = math.exp %232 : vector<8x256xf32>
    %cst_41 = arith.constant 1.000000e+00 : f32
    %234 = vector.broadcast %cst_41 : f32 to vector<8x256xf32>
    %235 = arith.addf %234, %233 : vector<8x256xf32>
    %236 = arith.divf %234, %235 : vector<8x256xf32>
    %237 = vector.extract_strided_slice %236 {offsets = [0, 0], sizes = [8, 64], strides = [1, 1]} : vector<8x256xf32> to vector<8x64xf32>
    %238 = vector.extract_strided_slice %236 {offsets = [0, 64], sizes = [8, 64], strides = [1, 1]} : vector<8x256xf32> to vector<8x64xf32>
    %239 = vector.extract_strided_slice %236 {offsets = [0, 128], sizes = [8, 64], strides = [1, 1]} : vector<8x256xf32> to vector<8x64xf32>
    %cst_42 = arith.constant 2.000000e+00 : f32
    %240 = vector.broadcast %cst_42 : f32 to vector<8x64xf32>
    %241 = arith.mulf %240, %239 : vector<8x64xf32>
    %cst_43 = arith.constant 1.000000e+00 : f32
    %242 = vector.broadcast %cst_43 : f32 to vector<8x64xf32>
    %243 = arith.subf %241, %242 : vector<8x64xf32>
    %244 = vector.extract_strided_slice %236 {offsets = [0, 192], sizes = [8, 64], strides = [1, 1]} : vector<8x256xf32> to vector<8x64xf32>
    %245 = arith.mulf %238, %219 : vector<8x64xf32>
    %246 = arith.mulf %237, %243 : vector<8x64xf32>
    %247 = arith.addf %245, %246 : vector<8x64xf32>
    %248 = math.tanh %247 : vector<8x64xf32>
    %249 = arith.mulf %244, %248 : vector<8x64xf32>
    %250 = vector.extract_strided_slice %249 {offsets = [0, 0], sizes = [8, 32], strides = [1, 1]} : vector<8x64xf32> to vector<8x32xf32>
    %251 = vector.extract_strided_slice %249 {offsets = [0, 32], sizes = [8, 32], strides = [1, 1]} : vector<8x64xf32> to vector<8x32xf32>
    %252 = tpu.concatenate %55, %83, %111, %139, %167, %195, %223, %250 in 0 : vector<8x32xf32>, vector<8x32xf32>, vector<8x32xf32>, vector<8x32xf32>, vector<8x32xf32>, vector<8x32xf32>, vector<8x32xf32>, vector<8x32xf32> -> vector<64x32xf32>
    %253 = arith.truncf %252 : vector<64x32xf32> to vector<64x32xbf16>
    %254 = tpu.concatenate %251, %224, %196, %168, %140, %112, %84, %56 in 0 : vector<8x32xf32>, vector<8x32xf32>, vector<8x32xf32>, vector<8x32xf32>, vector<8x32xf32>, vector<8x32xf32>, vector<8x32xf32>, vector<8x32xf32> -> vector<64x32xf32>
    %255 = arith.truncf %254 : vector<64x32xf32> to vector<64x32xbf16>
    %c0_44 = arith.constant 0 : index
    %c0_45 = arith.constant 0 : index
    %256 = vector.load %arg4[%c0_44, %c0_45] : memref<32x16xbf16, #tpu.memory_space<vmem>>, vector<32x16xbf16>
    %cst_46 = arith.constant dense<0.000000e+00> : vector<64x16xf32>
    %257 = tpu.matmul %253, %256, %cst_46 {dimension_numbers = #tpu.dot_dimension_numbers<[1], [0], [0], [1], [0, 0, 1, 1], [], []>} : vector<64x32xbf16>, vector<32x16xbf16>, vector<64x16xf32> -> vector<64x16xf32>
    %c0_47 = arith.constant 0 : index
    %c0_48 = arith.constant 0 : index
    %258 = vector.load %arg5[%c0_47, %c0_48] : memref<32x16xbf16, #tpu.memory_space<vmem>>, vector<32x16xbf16>
    %cst_49 = arith.constant dense<0.000000e+00> : vector<64x16xf32>
    %259 = tpu.matmul %255, %258, %cst_49 {dimension_numbers = #tpu.dot_dimension_numbers<[1], [0], [0], [1], [0, 0, 1, 1], [], []>} : vector<64x32xbf16>, vector<32x16xbf16>, vector<64x16xf32> -> vector<64x16xf32>
    %260 = arith.addf %257, %259 : vector<64x16xf32>
    %c0_50 = arith.constant 0 : index
    %c0_51 = arith.constant 0 : index
    %261 = vector.load %arg6[%c0_50, %c0_51] : memref<1x16xf32, #tpu.memory_space<vmem>>, vector<1x16xf32>
    %262 = vector.broadcast %261 : vector<1x16xf32> to vector<64x16xf32>
    %263 = arith.addf %260, %262 : vector<64x16xf32>
    %cst_52 = arith.constant dense<0xFF800000> : vector<64xf32>
    %264 = vector.multi_reduction <maximumf>, %263, %cst_52 [1] : vector<64x16xf32> to vector<64xf32>
    %265 = vector.shape_cast %264 : vector<64xf32> to vector<64x1xf32>
    %266 = vector.broadcast %265 : vector<64x1xf32> to vector<64x16xf32>
    %267 = arith.subf %263, %266 : vector<64x16xf32>
    %268 = math.exp %267 : vector<64x16xf32>
    %cst_53 = arith.constant dense<0.000000e+00> : vector<64xf32>
    %269 = vector.multi_reduction <add>, %268, %cst_53 [1] : vector<64x16xf32> to vector<64xf32>
    %270 = vector.shape_cast %269 : vector<64xf32> to vector<64x1xf32>
    %271 = math.log %270 : vector<64x1xf32>
    %272 = arith.addf %265, %271 : vector<64x1xf32>
    %273 = vector.broadcast %272 : vector<64x1xf32> to vector<64x16xf32>
    %274 = arith.subf %263, %273 : vector<64x16xf32>
    %c0_54 = arith.constant 0 : index
    %c0_55 = arith.constant 0 : index
    %275 = vector.load %arg7[%c0_54, %c0_55] : memref<64x16xf32, #tpu.memory_space<vmem>>, vector<64x16xf32>
    tpu.vector_store %arg7[%c0_54, %c0_55], %274 {strides = array<i32>} : memref<64x16xf32, #tpu.memory_space<vmem>>, vector<64x16xf32>,
    return
  }
}

</mosaic_0001>

<bundles_post_ra>
// kernel: pos_tagger_forward.1
= control target key start
LH: loop header
LB: loop body
LE: loop exit
PB: predicated region body
PF: predicated region fallthrough
CT: control target
= control target key end

     0   :  { %v1438_v1 = vmov 0   ;;  %vm91_vm0 = vcmask 261120   ;;  %v41_v17 = vlaneseq  ;;  %vm256_vm3 = vcmask 523264   ;;  %s1440_s9 = smov 32   ;;  %s1998_s1 = inlined_call_operand.vmem [shape: bf16[32,256], index: 1, kind: input, shape index: {}]   ;;  %s1999_s0 = inlined_call_operand.vmem [shape: bf16[64,32], index: 0, kind: input, shape index: {}]   ;;  %s2000_s2 = inlined_call_operand.vmem [shape: bf16[64,256], index: 2, kind: input, shape index: {}]   ;;  %s2001_s3 = inlined_call_operand.vmem [shape: f32[1,256], index: 3, kind: input, shape index: {}]   ;;  %s2002_s5 = inlined_call_operand.vmem [shape: bf16[32,16], index: 5, kind: input, shape index: {}]   ;;  %s2003_s4 = inlined_call_operand.vmem [shape: bf16[32,16], index: 4, kind: input, shape index: {}]   ;;  %s2004_s6 = inlined_call_operand.vmem [shape: f32[1,16], index: 6, kind: input, shape index: {}]   ;;  %s2005_s7 = inlined_call_operand.vmem [shape: f32[64,16], index: 7, kind: output, shape index: {}]  }
   0x1   :  { %v1300_v0 = vld [vmem:[%s1998_s1 + $0x4] ss:$8 sps:$4 sm:$0xff]   ;;  %136 = vmatprep.mubr.bf16.mxu0 %v1438_v1  ;;  %156 = vmatprep.mubr.bf16.mxu1 %v1438_v1  ;;  %v1302_v2 = vld [vmem:[%s1998_s1] ss:$8 sps:$4 sm:$0xff]   ;;  %v1303_v3 = vld [vmem:[%s1998_s1 + $0x14] ss:$8 sps:$4 sm:$0xff]  }
   0x2   :  { %104 = vmatprep.subr.bf16.mxu0 %v1300_v0  ;;  %1285 = vmatprep.subr.bf16.mxu1 %v1300_v0  ;;  %v1305_v4 = vld [vmem:[%s1998_s1 + $0x10] ss:$8 sps:$4 sm:$0xff]   ;;  %v1306_v5 = vld [vmem:[%s1999_s0] sm:$0xff]   ;;  %v1515_v9 = vld [vmem:[%s2000_s2 + $0x14] ss:$8 sps:$4 sm:$0xff]   ;;  %v42_v18 = vshrl.u32 %v41_v17, 7 }
   0x3   :  { %105 = vmatpush1.bf16.msra.mxu0 %v1302_v2  ;;  %1287 = vmatpush1.bf16.msra.mxu1 %v1302_v2  ;;  %v1501_v6 = vld [vmem:[%s2000_s2 + $0x4] ss:$8 sps:$4 sm:$0xff]   ;;  %v1307_v7 = vld [vmem:[%s1999_s0 + $0x10] sm:$0xff]   ;;  %v1509_v8 = vld [vmem:[%s2000_s2] ss:$8 sps:$4 sm:$0xff]   ;;  %v178_v23 = vand.u32 127, %v41_v17 }
   0x4   :  { %106 = vmatprep.subr.bf16.mxu0 %v1303_v3  ;;  %1286 = vmatprep.subr.bf16.mxu1 %v1303_v3  ;;  %v1524_v10 = vld [vmem:[%s2000_s2 + $0x10] ss:$8 sps:$4 sm:$0xff]   ;;  %v1532_v11 = vld [vmem:[%s2000_s2 + $0x24] ss:$8 sps:$4 sm:$0xff]   ;;  %v1546_v14 = vld [vmem:[%s2000_s2 + $0x20] ss:$8 sps:$4 sm:$0xff]  }
   0x5   :  { %v1314_v12 = vld [vmem:[%s1999_s0 + $0x8] sm:$0xff]   ;;  %v1315_v13 = vld [vmem:[%s1999_s0 + $0x18] sm:$0xff]   ;;  %v43_v19 = vsub.s32 0, %v42_v18  ;;  %v39_v20 = vld [vmem:[%s2001_s3] sm:$0x3]  ;;  %v47_v21 = vsub.s32 1, %v42_v18 }
   0x6   :  { %v1552_v15 = vld [vmem:[%s2000_s2 + $0x34] ss:$8 sps:$4 sm:$0xff]   ;;  %v1561_v16 = vld [vmem:[%s2000_s2 + $0x30] ss:$8 sps:$4 sm:$0xff]   ;;  %v179_v30 = vadd.s32 128, %v178_v23  ;;  %v184_v40 = vand.u32 63, %v178_v23 }
   0x7   :  { %107 = vmatpush1.bf16.msra.mxu0 %v1305_v4  ;;  %1288 = vmatpush1.bf16.msra.mxu1 %v1305_v4  ;;  %v44_v22 = vrot.slane %v39_v20, %v43_v19  ;;  %v48_v24 = vrot.slane %v39_v20, %v47_v21  ;;  %s1439_s3 = smov 64   ;;  %vm1068_vm4 = vcmask 130048  }
   0x8   :  { %260 = vmatprep.subr.bf16.mxu1 %v1501_v6  ;;  %406 = vmatprep.subr.bf16.mxu0 %v1501_v6  ;;  %v191_v41 = vand.u32 63, %v179_v30  ;;  %vm1598_vm1 = vcmp.lt.s32.totalorder %v184_v40, 32 }
   0xa   :  { %1193 = vmatmul.mubr.msk.bf16.vlgmr.msra.gmra.mrb[0].mxu0 %vm91_vm0, %v1306_v5  ;;  %1195 = vmatmul.mubr.msk.bf16.vlgmr.msra.gmra.mrb[0].mxu1 %vm91_vm0, %v1307_v7  ;;  %vm1608_vm2 = vcmp.lt.s32.totalorder %v191_v41, 32 }
   0xb   :  { %261 = vmatpush1.bf16.msra.mxu1 %v1509_v8  ;;  %146 = vmatprep.mubr.bf16.mxu0 %v1438_v1 }
   0xc   :  { %262 = vmatprep.subr.bf16.mxu1 %v1515_v9  ;;  %166 = vmatprep.mubr.bf16.mxu1 %v1438_v1 }
   0xd   :  { %407 = vmatpush1.bf16.msra.mxu0 %v1509_v8 }
   0xe   :  { %408 = vmatprep.subr.bf16.mxu0 %v1515_v9 }
   0xf   :  { %263 = vmatpush1.bf16.msra.mxu1 %v1524_v10 }
  0x10   :  { %264 = vmatprep.subr.bf16.mxu1 %v1532_v11 }
  0x11   :  { %409 = vmatpush1.bf16.msra.mxu0 %v1524_v10 }
  0x12   :  { %1194 = vmatmul.mubr.msk.bf16.gmra.mrb[4].mxu0 %vm91_vm0, %v1314_v12  ;;  %1196 = vmatmul.mubr.msk.bf16.gmra.mrb[4].mxu1 %vm91_vm0, %v1315_v13 }
  0x13   :  { %265 = vmatpush1.bf16.msra.mxu1 %v1546_v14  ;;  %292 = vmatprep.mubr.bf16.mxu1 %v1438_v1 }
  0x14   :  { %266 = vmatprep.subr.bf16.mxu1 %v1552_v15  ;;  %410 = vmatprep.subr.bf16.mxu0 %v1532_v11 }
  0x15   :  { %411 = vmatpush1.bf16.msra.mxu0 %v1546_v14  ;;  %438 = vmatprep.mubr.bf16.mxu0 %v1438_v1 }
  0x16   :  { %412 = vmatprep.subr.bf16.mxu0 %v1552_v15 }
  0x17   :  { %267 = vmatpush1.bf16.msra.mxu1 %v1561_v16 }
  0x18   :  { %333 = vmatprep.subr.bf16.mxu1 %v1501_v6 }
  0x19   :  { %413 = vmatpush1.bf16.msra.mxu0 %v1561_v16 }
  0x1a   :  { %293 = vmatmul.mubr.bf16.vlgmr.msra.gmra.mrb[8].mxu1 %v1438_v1  ;;  %552 = vmatprep.subr.bf16.mxu0 %v1501_v6 }
  0x1b   :  { %334 = vmatpush1.bf16.msra.mxu1 %v1509_v8  ;;  %365 = vmatprep.mubr.bf16.mxu1 %v1438_v1 }
  0x1c   :  { %335 = vmatprep.subr.bf16.mxu1 %v1515_v9 }
  0x1f   :  { %336 = vmatpush1.bf16.msra.mxu1 %v1524_v10 }
  0x20   :  { %337 = vmatprep.subr.bf16.mxu1 %v1532_v11 }
  0x23   :  { %338 = vmatpush1.bf16.msra.mxu1 %v1546_v14 }
  0x24   :  { %339 = vmatprep.subr.bf16.mxu1 %v1552_v15 }
  0x27   :  { %340 = vmatpush1.bf16.msra.mxu1 %v1561_v16 }
  0x28   :  { %479 = vmatprep.subr.bf16.mxu1 %v1501_v6 }
  0xdd   :  { %v158_v25 = vpop.f32.mrb[0].mxu1  ;;  %v138_v26 = vpop.f32.mrb[0].mxu0 }
  0xde   :  { %v1586_v27 = vadd.f32 %v158_v25, %v44_v22  ;;  %v160_v28 = vpop.f32.mrb[1].mxu1  ;;  %v140_v29 = vpop.f32.mrb[1].mxu0  ;;  %v1602_v45 = vadd.f32 %v138_v26, %v44_v22 }
  0xdf   :  { %v1588_v31 = vadd.f32 %v160_v28, %v48_v24  ;;  %v162_v32 = vpop.f32.mrb[2].mxu1  ;;  %v142_v33 = vpop.f32.mrb[2].mxu0  ;;  %v1612_v51 = vadd.f32 %v140_v29, %v48_v24 }
  0xe0   :  { %v1590_v34 = vadd.f32 %v162_v32, %v44_v22  ;;  %v164_v35 = vpop.f32.mrb[3].mxu1  ;;  %v1592_v36 = vadd.f32 %v142_v33, %v44_v22  ;;  %v144_v37 = vpop.f32.mrb[3].mxu0 }
  0xe1   :  { %v1594_v38 = vadd.f32 %v164_v35, %v48_v24  ;;  %v1596_v39 = vadd.f32 %v144_v37, %v48_v24 }
  0xe5   :  { %v148_v42 = vpop.f32.mrb[4].mxu0  ;;  %v168_v43 = vpop.f32.mrb[4].mxu1 }
  0xe6   :  { %v1604_v46 = vadd.f32 %v148_v42, %v44_v22  ;;  %v1606_v47 = vadd.f32 %v168_v43, %v44_v22  ;;  %v150_v48 = vpop.f32.mrb[5].mxu0  ;;  %v170_v49 = vpop.f32.mrb[5].mxu1 }
  0xe7   :  { %v1614_v52 = vadd.f32 %v150_v48, %v48_v24  ;;  %v1616_v53 = vadd.f32 %v170_v49, %v48_v24  ;;  %v152_v54 = vpop.f32.mrb[6].mxu0  ;;  %v172_v55 = vpop.f32.mrb[6].mxu1 }
  0xe8   :  { %v1618_v56 = vadd.f32 %v152_v54, %v44_v22  ;;  %v1620_v57 = vadd.f32 %v172_v55, %v44_v22  ;;  %v154_v58 = vpop.f32.mrb[7].mxu0  ;;  %v174_v59 = vpop.f32.mrb[7].mxu1  ;;  %v325_v60 = vsel %vm1598_vm1, %v1592_v36, %v1606_v47  ;;  %v398_v61 = vsel %vm1598_vm1, %v1604_v46, %v1590_v34 }
  0xe9   :  { %v1630_v62 = vadd.f32 %v154_v58, %v48_v24  ;;  %v1632_v63 = vadd.f32 %v174_v59, %v48_v24  ;;  %v326_v0 = vsel %vm1608_vm2, %v1596_v39, %v1616_v53  ;;  %v399_v2 = vsel %vm1608_vm2, %v1614_v52, %v1594_v38 }
  0xea   :  { %v214_v3 = vsel %vm1598_vm1, %v1602_v45, %v1620_v57  ;;  %v471_v4 = vsel %vm1598_vm1, %v1618_v56, %v1586_v27  ;;  %v544_v5 = vsel %vm1598_vm1, %v1586_v27, %v1618_v56  ;;  %v617_v7 = vsel %vm1598_vm1, %v1590_v34, %v1604_v46 }
  0xeb   :  { %v215_v12 = vsel %vm1608_vm2, %v1612_v51, %v1632_v63  ;;  %v472_v13 = vsel %vm1608_vm2, %v1630_v62, %v1588_v31  ;;  %v545_v17 = vsel %vm1608_vm2, %v1588_v31, %v1630_v62  ;;  %v618_v18 = vsel %vm1608_vm2, %v1594_v38, %v1614_v52 }
  0xec   :  { %v690_v19 = vsel %vm1598_vm1, %v1606_v47, %v1592_v36  ;;  %v691_v20 = vsel %vm1608_vm2, %v1616_v53, %v1596_v39  ;;  %v763_v21 = vsel %vm1598_vm1, %v1620_v57, %v1602_v45  ;;  %v764_v22 = vsel %vm1608_vm2, %v1632_v63, %v1612_v51 }
  0xed   :  { %v294_v23 = vpop.f32.mrb[8].mxu1 }
  0xee   :  { %v295_v24 = vadd.f32 %v294_v23, %v214_v3  ;;  %v296_v25 = vpop.f32.mrb[9].mxu1 }
  0xef   :  { %v297_v26 = vadd.f32 %v296_v25, %v215_v12  ;;  %v298_v28 = vpop.f32.mrb[10].mxu1 }
  0xf0   :  { %v1205_v29 = vmul.f32 -1.442695, %v295_v24  ;;  %v299_v30 = vpop.f32.mrb[11].mxu1 }
  0xf1   :  { %v1206_v32 = vmul.f32 -1.442695, %v297_v26 }
  0xf2   :  { %1326 = vpow2.f32 %v1205_v29 }
  0xf3   :  { %1328 = vpow2.f32 %v1206_v32 }
  0xfc   :  { %v1327_v33 = vpop.eup %1326 }
  0xfd   :  { %v1329_v35 = vpop.eup %1328  ;;  %v307_v40 = vadd.f32 1.0, %v1327_v33 }
  0xfe   :  { %v308_v37 = vadd.f32 1.0, %v1329_v35 }
 0x100   :  { %1330 = vrcp.f32 %v308_v37 }
 0x101   :  { %1332 = vrcp.f32 %v307_v40 }
 0x10a   :  { %v1331_v41 = vpop.eup %1330 }
 0x10b   :  { %v313_v42 = vmul.f32 2.0, %v1331_v41  ;;  %v1333_v48 = vpop.eup %1332 }
 0x10c   :  { %v315_v54 = vmul.f32 0.0, %v1333_v48 }
 0x10d   :  { %v1207_v43 = vadd.f32 -1.0, %v313_v42 }
 0x10f   :  { %v316_v49 = vmul.f32 %v1333_v48, %v1207_v43 }
 0x111   :  { %318 = vrot.lane.b32.xlu0 %v316_v49, %s1439_s3 }
 0x183   :  { %v319_v55 = vpop.permute.xlu0 %318 }
 0x184   :  { %v321_v58 = vadd.f32 %v319_v55, %v315_v54 }
 0x186   :  { %1334 = vtanh.f32 %v321_v58 }
 0x190   :  { %v1335_v59 = vpop.eup %1334 }
 0x191   :  { %v1691_v3 = vmul.f32 %v1335_v59, %v1331_v41 }
 0x193   :  { %v324_v12 = vpack.c.bf16 %v1691_v3, %v1691_v3 }
 0x195   :  { %328 = vrot.lane.b32.xlu0 %v324_v12, %s1439_s3 }
 0x207   :  { %v329_v23 = vpop.permute.xlu0 %328 }
 0x208   :  { %1208 = vmatmul.mubr.msk.bf16.vlgmr.msra.gmra.mrb[12].mxu1 %vm256_vm3, %v329_v23 }
 0x209   :  { %480 = vmatpush1.bf16.msra.mxu1 %v1509_v8  ;;  %511 = vmatprep.mubr.bf16.mxu1 %v1438_v1 }
 0x20a   :  { %481 = vmatprep.subr.bf16.mxu1 %v1515_v9 }
 0x20d   :  { %482 = vmatpush1.bf16.msra.mxu1 %v1524_v10 }
 0x20e   :  { %483 = vmatprep.subr.bf16.mxu1 %v1532_v11 }
 0x211   :  { %484 = vmatpush1.bf16.msra.mxu1 %v1546_v14 }
 0x212   :  { %485 = vmatprep.subr.bf16.mxu1 %v1552_v15 }
 0x215   :  { %486 = vmatpush1.bf16.msra.mxu1 %v1561_v16 }
 0x216   :  { %625 = vmatprep.subr.bf16.mxu1 %v1501_v6 }
 0x2db   :  { %v367_v24 = vpop.f32.mrb[12].mxu1 }
 0x2dc   :  { %v368_v25 = vadd.f32 %v367_v24, %v325_v60  ;;  %v369_v26 = vpop.f32.mrb[13].mxu1 }
 0x2dd   :  { %v370_v28 = vadd.f32 %v369_v26, %v326_v0  ;;  %v371_v29 = vpop.f32.mrb[14].mxu1 }
 0x2de   :  { %v1209_v30 = vmul.f32 -1.442695, %v368_v25  ;;  %v372_v32 = vpop.f32.mrb[15].mxu1 }
 0x2df   :  { %v1210_v33 = vmul.f32 -1.442695, %v370_v28 }
 0x2e0   :  { %1336 = vpow2.f32 %v1209_v30 }
 0x2e1   :  { %1338 = vpow2.f32 %v1210_v33 }
 0x2ea   :  { %v1337_v35 = vpop.eup %1336 }
 0x2eb   :  { %v1339_v37 = vpop.eup %1338  ;;  %v380_v41 = vadd.f32 1.0, %v1337_v35 }
 0x2ec   :  { %v381_v40 = vadd.f32 1.0, %v1339_v37 }
 0x2ee   :  { %1340 = vrcp.f32 %v381_v40 }
 0x2ef   :  { %1342 = vrcp.f32 %v380_v41 }
 0x2f8   :  { %v1341_v42 = vpop.eup %1340 }
 0x2f9   :  { %v386_v43 = vmul.f32 2.0, %v1341_v42  ;;  %v1343_v49 = vpop.eup %1342 }
 0x2fa   :  { %v388_v60 = vmul.f32 %v1343_v49, %v321_v58 }
 0x2fb   :  { %v1211_v48 = vadd.f32 -1.0, %v386_v43 }
 0x2fd   :  { %v389_v54 = vmul.f32 %v1343_v49, %v1211_v48 }
 0x2ff   :  { %391 = vrot.lane.b32.xlu1 %v389_v54, %s1439_s3 }
 0x371   :  { %v392_v0 = vpop.permute.xlu1 %391 }
 0x372   :  { %v394_v55 = vadd.f32 %v392_v0, %v388_v60 }
 0x374   :  { %1344 = vtanh.f32 %v394_v55 }
 0x37e   :  { %v1345_v59 = vpop.eup %1344 }
 0x37f   :  { %v1707_v12 = vmul.f32 %v1345_v59, %v1341_v42 }
 0x381   :  { %v397_v23 = vpack.c.bf16 %v1707_v12, %v1707_v12  ;;  %v842_v63 = vpack.c.bf16 %v1691_v3, %v1707_v12 }
 0x383   :  { %401 = vrot.lane.b32.xlu1 %v397_v23, %s1439_s3 }
 0x3f5   :  { %v402_v24 = vpop.permute.xlu1 %401 }
 0x3f6   :  { %1212 = vmatmul.mubr.msk.bf16.vlgmr.msra.gmra.mrb[8].mxu0 %vm256_vm3, %v402_v24 }
 0x3f7   :  { %553 = vmatpush1.bf16.msra.mxu0 %v1509_v8  ;;  %584 = vmatprep.mubr.bf16.mxu0 %v1438_v1 }
 0x3f8   :  { %554 = vmatprep.subr.bf16.mxu0 %v1515_v9 }
 0x3fb   :  { %555 = vmatpush1.bf16.msra.mxu0 %v1524_v10 }
 0x3fc   :  { %556 = vmatprep.subr.bf16.mxu0 %v1532_v11 }
 0x3ff   :  { %557 = vmatpush1.bf16.msra.mxu0 %v1546_v14 }
 0x400   :  { %558 = vmatprep.subr.bf16.mxu0 %v1552_v15 }
 0x403   :  { %559 = vmatpush1.bf16.msra.mxu0 %v1561_v16 }
 0x404   :  { %698 = vmatprep.subr.bf16.mxu0 %v1501_v6 }
 0x4c9   :  { %v440_v58 = vpop.f32.mrb[8].mxu0 }
 0x4ca   :  { %v441_v25 = vadd.f32 %v440_v58, %v398_v61  ;;  %v442_v26 = vpop.f32.mrb[9].mxu0 }
 0x4cb   :  { %v443_v28 = vadd.f32 %v442_v26, %v399_v2  ;;  %v444_v29 = vpop.f32.mrb[10].mxu0 }
 0x4cc   :  { %v1213_v30 = vmul.f32 -1.442695, %v441_v25  ;;  %v445_v32 = vpop.f32.mrb[11].mxu0 }
 0x4cd   :  { %v1214_v33 = vmul.f32 -1.442695, %v443_v28 }
 0x4ce   :  { %1346 = vpow2.f32 %v1213_v30 }
 0x4cf   :  { %1348 = vpow2.f32 %v1214_v33 }
 0x4d8   :  { %v1347_v35 = vpop.eup %1346 }
 0x4d9   :  { %v1349_v37 = vpop.eup %1348  ;;  %v453_v41 = vadd.f32 1.0, %v1347_v35 }
 0x4da   :  { %v454_v40 = vadd.f32 1.0, %v1349_v37 }
 0x4dc   :  { %1350 = vrcp.f32 %v454_v40 }
 0x4dd   :  { %1352 = vrcp.f32 %v453_v41 }
 0x4e6   :  { %v1351_v61 = vpop.eup %1350 }
 0x4e7   :  { %v459_v42 = vmul.f32 2.0, %v1351_v61  ;;  %v1353_v48 = vpop.eup %1352 }
 0x4e8   :  { %v461_v2 = vmul.f32 %v1353_v48, %v394_v55 }
 0x4e9   :  { %v1215_v43 = vadd.f32 -1.0, %v459_v42 }
 0x4eb   :  { %v462_v49 = vmul.f32 %v1353_v48, %v1215_v43 }
 0x4ed   :  { %464 = vrot.lane.b32.xlu0 %v462_v49, %s1439_s3 }
 0x55f   :  { %v465_v54 = vpop.permute.xlu0 %464 }
 0x560   :  { %v467_v60 = vadd.f32 %v465_v54, %v461_v2 }
 0x562   :  { %1354 = vtanh.f32 %v467_v60 }
 0x56c   :  { %v1355_v0 = vpop.eup %1354 }
 0x56d   :  { %v1733_v59 = vmul.f32 %v1355_v0, %v1351_v61 }
 0x56f   :  { %v470_v23 = vpack.c.bf16 %v1733_v59, %v1733_v59 }
 0x571   :  { %474 = vrot.lane.b32.xlu1 %v470_v23, %s1439_s3 }
 0x5e3   :  { %v475_v24 = vpop.permute.xlu1 %474 }
 0x5e4   :  { %1216 = vmatmul.mubr.msk.bf16.vlgmr.msra.gmra.mrb[16].mxu1 %vm256_vm3, %v475_v24 }
 0x5e5   :  { %626 = vmatpush1.bf16.msra.mxu1 %v1509_v8  ;;  %657 = vmatprep.mubr.bf16.mxu1 %v1438_v1 }
 0x5e6   :  { %627 = vmatprep.subr.bf16.mxu1 %v1515_v9 }
 0x5e9   :  { %628 = vmatpush1.bf16.msra.mxu1 %v1524_v10 }
 0x5ea   :  { %629 = vmatprep.subr.bf16.mxu1 %v1532_v11 }
 0x5ed   :  { %630 = vmatpush1.bf16.msra.mxu1 %v1546_v14 }
 0x5ee   :  { %631 = vmatprep.subr.bf16.mxu1 %v1552_v15 }
 0x5f1   :  { %632 = vmatpush1.bf16.msra.mxu1 %v1561_v16 }
 0x5f2   :  { %771 = vmatprep.subr.bf16.mxu1 %v1501_v6 }
 0x6b7   :  { %v513_v55 = vpop.f32.mrb[16].mxu1 }
 0x6b8   :  { %v514_v58 = vadd.f32 %v513_v55, %v471_v4  ;;  %v515_v25 = vpop.f32.mrb[17].mxu1 }
 0x6b9   :  { %v516_v26 = vadd.f32 %v515_v25, %v472_v13  ;;  %v517_v28 = vpop.f32.mrb[18].mxu1 }
 0x6ba   :  { %v1217_v29 = vmul.f32 -1.442695, %v514_v58  ;;  %v518_v30 = vpop.f32.mrb[19].mxu1 }
 0x6bb   :  { %v1218_v32 = vmul.f32 -1.442695, %v516_v26 }
 0x6bc   :  { %1356 = vpow2.f32 %v1217_v29 }
 0x6bd   :  { %1358 = vpow2.f32 %v1218_v32 }
 0x6c6   :  { %v1357_v6 = vpop.eup %1356 }
 0x6c7   :  { %v1359_v33 = vpop.eup %1358  ;;  %v526_v37 = vadd.f32 1.0, %v1357_v6 }
 0x6c8   :  { %v527_v35 = vadd.f32 1.0, %v1359_v33 }
 0x6ca   :  { %1360 = vrcp.f32 %v527_v35 }
 0x6cb   :  { %1362 = vrcp.f32 %v526_v37 }
 0x6d4   :  { %v1361_v4 = vpop.eup %1360 }
 0x6d5   :  { %v532_v40 = vmul.f32 2.0, %v1361_v4  ;;  %v1363_v61 = vpop.eup %1362 }
 0x6d6   :  { %v534_v13 = vmul.f32 %v1363_v61, %v467_v60 }
 0x6d7   :  { %v1219_v41 = vadd.f32 -1.0, %v532_v40 }
 0x6d9   :  { %v535_v42 = vmul.f32 %v1363_v61, %v1219_v41 }
 0x6db   :  { %537 = vrot.lane.b32.xlu0 %v535_v42, %s1439_s3 }
 0x74d   :  { %v538_v43 = vpop.permute.xlu0 %537 }
 0x74e   :  { %v540_v48 = vadd.f32 %v538_v43, %v534_v13 }
 0x750   :  { %1364 = vtanh.f32 %v540_v48 }
 0x75a   :  { %v1365_v49 = vpop.eup %1364 }
 0x75b   :  { %v1759_v2 = vmul.f32 %v1365_v49, %v1361_v4 }
 0x75d   :  { %v543_v54 = vpack.c.bf16 %v1759_v2, %v1759_v2 }
 0x75f   :  { %547 = vrot.lane.b32.xlu1 %v543_v54, %s1439_s3 }
 0x7d1   :  { %v548_v0 = vpop.permute.xlu1 %547 }
 0x7d2   :  { %1220 = vmatmul.mubr.msk.bf16.vlgmr.msra.gmra.mrb[12].mxu0 %vm256_vm3, %v548_v0 }
 0x7d3   :  { %699 = vmatpush1.bf16.msra.mxu0 %v1509_v8  ;;  %730 = vmatprep.mubr.bf16.mxu0 %v1438_v1 }
 0x7d4   :  { %700 = vmatprep.subr.bf16.mxu0 %v1515_v9 }
 0x7d7   :  { %701 = vmatpush1.bf16.msra.mxu0 %v1524_v10 }
 0x7d8   :  { %702 = vmatprep.subr.bf16.mxu0 %v1532_v11 }
 0x7db   :  { %703 = vmatpush1.bf16.msra.mxu0 %v1546_v14 }
 0x7dc   :  { %704 = vmatprep.subr.bf16.mxu0 %v1552_v15 }
 0x7df   :  { %705 = vmatpush1.bf16.msra.mxu0 %v1561_v16 }
 0x8a5   :  { %v586_v60 = vpop.f32.mrb[12].mxu0 }
 0x8a6   :  { %v587_v23 = vadd.f32 %v586_v60, %v544_v5  ;;  %v588_v24 = vpop.f32.mrb[13].mxu0 }
 0x8a7   :  { %v589_v55 = vadd.f32 %v588_v24, %v545_v17  ;;  %v590_v58 = vpop.f32.mrb[14].mxu0 }
 0x8a8   :  { %v1221_v25 = vmul.f32 -1.442695, %v587_v23  ;;  %v591_v26 = vpop.f32.mrb[15].mxu0 }
 0x8a9   :  { %v1222_v28 = vmul.f32 -1.442695, %v589_v55 }
 0x8aa   :  { %1366 = vpow2.f32 %v1221_v25 }
 0x8ab   :  { %1368 = vpow2.f32 %v1222_v28 }
 0x8b4   :  { %v1367_v29 = vpop.eup %1366 }
 0x8b5   :  { %v1369_v30 = vpop.eup %1368  ;;  %v599_v6 = vadd.f32 1.0, %v1367_v29 }
 0x8b6   :  { %v600_v32 = vadd.f32 1.0, %v1369_v30 }
 0x8b8   :  { %1370 = vrcp.f32 %v600_v32 }
 0x8b9   :  { %1372 = vrcp.f32 %v599_v6 }
 0x8c2   :  { %v1371_v27 = vpop.eup %1370 }
 0x8c3   :  { %v605_v56 = vmul.f32 2.0, %v1371_v27  ;;  %v1373_v33 = vpop.eup %1372 }
 0x8c4   :  { %v607_v31 = vmul.f32 %v1373_v33, %v540_v48 }
 0x8c5   :  { %v1223_v5 = vadd.f32 -1.0, %v605_v56 }
 0x8c7   :  { %v608_v35 = vmul.f32 %v1373_v33, %v1223_v5 }
 0x8c9   :  { %610 = vrot.lane.b32.xlu0 %v608_v35, %s1439_s3 }
 0x93b   :  { %v611_v62 = vpop.permute.xlu0 %610 }
 0x93c   :  { %v613_v17 = vadd.f32 %v611_v62, %v607_v31 }
 0x93e   :  { %1374 = vtanh.f32 %v613_v17 }
 0x948   :  { %v1375_v37 = vpop.eup %1374 }
 0x949   :  { %v1784_v4 = vmul.f32 %v1375_v37, %v1371_v27 }
 0x94b   :  { %v616_v40 = vpack.c.bf16 %v1784_v4, %v1784_v4 }
 0x94d   :  { %620 = vrot.lane.b32.xlu1 %v616_v40, %s1439_s3 }
 0x9bf   :  { %v621_v41 = vpop.permute.xlu1 %620 }
 0x9c0   :  { %1224 = vmatmul.mubr.msk.bf16.vlgmr.msra.gmra.mrb[20].mxu1 %vm256_vm3, %v621_v41 }
 0x9c1   :  { %772 = vmatpush1.bf16.msra.mxu1 %v1509_v8  ;;  %803 = vmatprep.mubr.bf16.mxu1 %v1438_v1 }
 0x9c2   :  { %773 = vmatprep.subr.bf16.mxu1 %v1515_v9 }
 0x9c5   :  { %774 = vmatpush1.bf16.msra.mxu1 %v1524_v10 }
 0x9c6   :  { %775 = vmatprep.subr.bf16.mxu1 %v1532_v11 }
 0x9c9   :  { %776 = vmatpush1.bf16.msra.mxu1 %v1546_v14 }
 0x9ca   :  { %777 = vmatprep.subr.bf16.mxu1 %v1552_v15 }
 0x9cd   :  { %778 = vmatpush1.bf16.msra.mxu1 %v1561_v16 }
 0xa93   :  { %v659_v61 = vpop.f32.mrb[20].mxu1 }
 0xa94   :  { %v660_v8 = vadd.f32 %v659_v61, %v617_v7  ;;  %v661_v1 = vpop.f32.mrb[21].mxu1 }
 0xa95   :  { %v662_v9 = vadd.f32 %v661_v1, %v618_v18  ;;  %v663_v10 = vpop.f32.mrb[22].mxu1 }
 0xa96   :  { %v1225_v11 = vmul.f32 -1.442695, %v660_v8  ;;  %v664_v14 = vpop.f32.mrb[23].mxu1 }
 0xa97   :  { %v1226_v15 = vmul.f32 -1.442695, %v662_v9 }
 0xa98   :  { %1376 = vpow2.f32 %v1225_v11 }
 0xa99   :  { %1378 = vpow2.f32 %v1226_v15 }
 0xaa2   :  { %v1377_v16 = vpop.eup %1376 }
 0xaa3   :  { %v1379_v42 = vpop.eup %1378  ;;  %v672_v43 = vadd.f32 1.0, %v1377_v16 }
 0xaa4   :  { %v673_v13 = vadd.f32 1.0, %v1379_v42  ;;  %v1322_v42 = vld [vmem:[%s2002_s5] sm:$0xff]  }
 0xaa5   :  { %1261 = vmatprep.subr.bf16.mxu0 %v1322_v42 }
 0xaa6   :  { %1380 = vrcp.f32 %v673_v13  ;;  %v1323_v13 = vld [vmem:[%s2002_s5 + $0x8] sm:$0xff]  }
 0xaa7   :  { %1382 = vrcp.f32 %v672_v43 }
 0xab0   :  { %v1381_v34 = vpop.eup %1380 }
 0xab1   :  { %v678_v46 = vmul.f32 2.0, %v1381_v34  ;;  %v1383_v48 = vpop.eup %1382 }
 0xab2   :  { %v680_v38 = vmul.f32 %v1383_v48, %v613_v17 }
 0xab3   :  { %v1227_v7 = vadd.f32 -1.0, %v678_v46 }
 0xab5   :  { %v681_v49 = vmul.f32 %v1383_v48, %v1227_v7  ;;  %v1324_v7 = vld [vmem:[%s2003_s4] sm:$0xff]  }
 0xab7   :  { %683 = vrot.lane.b32.xlu0 %v681_v49, %s1439_s3 }
 0xb29   :  { %v684_v52 = vpop.permute.xlu0 %683 }
 0xb2a   :  { %v686_v18 = vadd.f32 %v684_v52, %v680_v38 }
 0xb2c   :  { %1384 = vtanh.f32 %v686_v18 }
 0xb36   :  { %v1385_v54 = vpop.eup %1384 }
 0xb37   :  { %v1809_v0 = vmul.f32 %v1385_v54, %v1381_v34  ;;  %v835_v54 = vpack.c.bf16 %v1707_v12, %v1691_v3 }
 0xb39   :  { %v689_v60 = vpack.c.bf16 %v1809_v0, %v1809_v0  ;;  %v840_v51 = vpack.c.bf16 %v1784_v4, %v1809_v0 }
 0xb3b   :  { %693 = vrot.lane.b32.xlu1 %v689_v60, %s1439_s3  ;;  %v837_v60 = vpack.c.bf16 %v1809_v0, %v1784_v4 }
 0xbad   :  { %v694_v23 = vpop.permute.xlu1 %693 }
 0xbae   :  { %1228 = vmatmul.mubr.msk.bf16.vlgmr.msra.gmra.mrb[16].mxu0 %vm256_vm3, %v694_v23 }
 0xbaf   :  { %1262 = vmatpush3.bf16.msra.mxu0 %v1322_v42 }
 0xbb0   :  { %1263 = vmatprep.subr.bf16.mxu0 %v1323_v13 }
 0xbb3   :  { %1264 = vmatpush3.bf16.msra.mxu0 %v1323_v13 }
 0xbb4   :  { %1273 = vmatprep.subr.bf16.mxu0 %v1324_v7 }
 0xc81   :  { %v732_v24 = vpop.f32.mrb[16].mxu0 }
 0xc82   :  { %v733_v55 = vadd.f32 %v732_v24, %v690_v19  ;;  %v734_v58 = vpop.f32.mrb[17].mxu0  ;;  %v1325_v24 = vld [vmem:[%s2003_s4 + $0x8] sm:$0xff]  }
 0xc83   :  { %v735_v25 = vadd.f32 %v734_v58, %v691_v20  ;;  %v736_v26 = vpop.f32.mrb[18].mxu0  ;;  %v1248_v58 = vld [vmem:[%s2004_s6] ss:$0 sm:$0xff] }
 0xc84   :  { %v1229_v28 = vmul.f32 -1.442695, %v733_v55  ;;  %v737_v29 = vpop.f32.mrb[19].mxu0 }
 0xc85   :  { %v1230_v30 = vmul.f32 -1.442695, %v735_v25 }
 0xc86   :  { %1386 = vpow2.f32 %v1229_v28 }
 0xc87   :  { %1388 = vpow2.f32 %v1230_v30 }
 0xc90   :  { %v1387_v32 = vpop.eup %1386 }
 0xc91   :  { %v1389_v6 = vpop.eup %1388  ;;  %v745_v56 = vadd.f32 1.0, %v1387_v32 }
 0xc92   :  { %v746_v27 = vadd.f32 1.0, %v1389_v6 }
 0xc94   :  { %1390 = vrcp.f32 %v746_v27 }
 0xc95   :  { %1392 = vrcp.f32 %v745_v56 }
 0xc9e   :  { %v1391_v36 = vpop.eup %1390 }
 0xc9f   :  { %v751_v47 = vmul.f32 2.0, %v1391_v36  ;;  %v1393_v5 = vpop.eup %1392 }
 0xca0   :  { %v753_v39 = vmul.f32 %v1393_v5, %v686_v18  ;;  %v841_v18 = vpack.c.bf16 %v1733_v59, %v1759_v2 }
 0xca1   :  { %v1231_v19 = vadd.f32 -1.0, %v751_v47 }
 0xca3   :  { %v754_v33 = vmul.f32 %v1393_v5, %v1231_v19 }
 0xca5   :  { %756 = vrot.lane.b32.xlu0 %v754_v33, %s1439_s3 }
 0xd17   :  { %v757_v53 = vpop.permute.xlu0 %756 }
 0xd18   :  { %v759_v20 = vadd.f32 %v757_v53, %v753_v39 }
 0xd1a   :  { %1394 = vtanh.f32 %v759_v20 }
 0xd24   :  { %v1395_v35 = vpop.eup %1394 }
 0xd25   :  { %v761_v31 = vmul.f32 %v1395_v35, %v1391_v36 }
 0xd27   :  { %v762_v62 = vpack.c.bf16 %v761_v31, %v761_v31 }
 0xd29   :  { %766 = vrot.lane.b32.xlu1 %v762_v62, %s1439_s3 }
 0xd9b   :  { %v767_v17 = vpop.permute.xlu1 %766 }
 0xd9c   :  { %1232 = vmatmul.mubr.msk.bf16.vlgmr.msra.gmra.mrb[24].mxu1 %vm256_vm3, %v767_v17 }
 0xe6f   :  { %v805_v37 = vpop.f32.mrb[24].mxu1 }
 0xe70   :  { %v806_v40 = vadd.f32 %v805_v37, %v763_v21  ;;  %v807_v41 = vpop.f32.mrb[25].mxu1 }
 0xe71   :  { %v808_v61 = vadd.f32 %v807_v41, %v764_v22  ;;  %v809_v8 = vpop.f32.mrb[26].mxu1  ;;  %v836_v22 = vpack.c.bf16 %v1759_v2, %v1733_v59 }
 0xe72   :  { %v1233_v1 = vmul.f32 -1.442695, %v806_v40  ;;  %v810_v9 = vpop.f32.mrb[27].mxu1 }
 0xe73   :  { %v1234_v10 = vmul.f32 -1.442695, %v808_v61 }
 0xe74   :  { %1396 = vpow2.f32 %v1233_v1 }
 0xe75   :  { %1398 = vpow2.f32 %v1234_v10 }
 0xe7e   :  { %v1397_v11 = vpop.eup %1396 }
 0xe7f   :  { %v1399_v14 = vpop.eup %1398  ;;  %v818_v15 = vadd.f32 1.0, %v1397_v11 }
 0xe80   :  { %v819_v44 = vadd.f32 1.0, %v1399_v14 }
 0xe82   :  { %1400 = vrcp.f32 %v819_v44 }
 0xe83   :  { %1402 = vrcp.f32 %v818_v15 }
 0xe8c   :  { %v1401_v45 = vpop.eup %1400 }
 0xe8d   :  { %v824_v57 = vmul.f32 2.0, %v1401_v45  ;;  %v1403_v50 = vpop.eup %1402 }
 0xe8e   :  { %v826_v43 = vmul.f32 %v1403_v50, %v759_v20 }
 0xe8f   :  { %v1235_v21 = vadd.f32 -1.0, %v824_v57 }
 0xe91   :  { %v827_v16 = vmul.f32 %v1403_v50, %v1235_v21 }
 0xe93   :  { %829 = vrot.lane.b32.xlu0 %v827_v16, %s1439_s3 }
 0xe97   :  { %857 = vrot.lane.b32.xlu0 %v840_v51, %s1440_s9 }
 0xe9b   :  { %861 = vrot.lane.b32.xlu0 %v842_v63, %s1440_s9 }
 0xe9f   :  { %958 = vrot.lane.b32.xlu0 %v836_v22, %s1439_s3 }
 0xf05   :  { %v830_v34 = vpop.permute.xlu0 %829 }
 0xf06   :  { %v832_v46 = vadd.f32 %v830_v34, %v826_v43 }
 0xf08   :  { %1404 = vtanh.f32 %v832_v46 }
 0xf09   :  { %v858_v55 = vpop.permute.xlu0 %857 }
 0xf0d   :  { %v862_v3 = vpop.permute.xlu0 %861 }
 0xf11   :  { %v959_v2 = vpop.permute.xlu0 %958 }
 0xf12   :  { %v1405_v48 = vpop.eup %1404 }
 0xf13   :  { %v834_v49 = vmul.f32 %v1405_v48, %v1401_v45 }
 0xf15   :  { %v839_v38 = vpack.c.bf16 %v761_v31, %v834_v49  ;;  %v838_v52 = vpack.c.bf16 %v834_v49, %v761_v31 }
 0xf17   :  { %855 = vrot.lane.b32.xlu1 %v839_v38, %s1440_s9  ;;  %962 = vrot.lane.b32.xlu0 %v838_v52, %s1439_s3 }
 0xf1b   :  { %859 = vrot.lane.b32.xlu1 %v841_v18, %s1440_s9 }
 0xf1f   :  { %956 = vrot.lane.b32.xlu1 %v835_v54, %s1439_s3 }
 0xf23   :  { %960 = vrot.lane.b32.xlu1 %v837_v60, %s1439_s3 }
 0xf89   :  { %v856_v23 = vpop.permute.xlu1 %855  ;;  %v963_v0 = vpop.permute.xlu0 %962 }
 0xf8a   :  { %1265 = vmatprep.mubr.msk.bf16.mxu0 %vm91_vm0, %v856_v23 }
 0xf8b   :  { %1266 = vmatmul.mubr.msk.bf16.vlgmr.msra.gmra.mrb[20].mxu0 %vm91_vm0, %v858_v55 }
 0xf8c   :  { %1274 = vmatpush3.bf16.msra.mxu0 %v1324_v7 }
 0xf8d   :  { %v860_v59 = vpop.permute.xlu1 %859  ;;  %1275 = vmatprep.subr.bf16.mxu0 %v1325_v24 }
 0xf8e   :  { %1269 = vmatprep.mubr.msk.bf16.mxu0 %vm91_vm0, %v860_v59 }
 0xf90   :  { %1276 = vmatpush3.bf16.msra.mxu0 %v1325_v24 }
 0xf91   :  { %v957_v12 = vpop.permute.xlu1 %956 }
 0xf93   :  { %1270 = vmatmul.mubr.msk.bf16.gmra.mrb[24].mxu0 %vm91_vm0, %v862_v3 }
 0xf94   :  { %1277 = vmatprep.mubr.msk.bf16.mxu0 %vm91_vm0, %v957_v12 }
 0xf95   :  { %v961_v4 = vpop.permute.xlu1 %960 }
 0xf9b   :  { %1278 = vmatmul.mubr.msk.bf16.vlgmr.msra.gmra.mrb[20].mxu0 %vm91_vm0, %v959_v2 }
 0xf9c   :  { %1281 = vmatprep.mubr.msk.bf16.mxu0 %vm91_vm0, %v961_v4 }
 0xfa3   :  { %1282 = vmatmul.mubr.msk.bf16.gmra.mrb[24].mxu0 %vm91_vm0, %v963_v0 }
0x106e   :  { %v1279_v25 = vpop.f32.mrb[20].mxu0 }
0x106f   :  { %v1878_v26 = vadd.f32 %v1279_v25, %v1248_v58  ;;  %v1022_v28 = vpop.f32.mrb[21].mxu0 }
0x1070   :  { %v1880_v29 = vadd.f32 %v1248_v58, %v1022_v28  ;;  %v1280_v30 = vpop.f32.mrb[22].mxu0 }
0x1071   :  { %v1025_v32 = vpop.f32.mrb[23].mxu0  ;;  %v1075_v6 = vsel %vm1068_vm4, %v1878_v26, -inf  ;;  %v1884_v27 = vadd.f32 %v1280_v30, %v1248_v58 }
0x1072   :  { %v1886_v56 = vadd.f32 %v1248_v58, %v1025_v32  ;;  %1076 = vmax.xlane.f32.xlu0 %v1075_v6  ;;  %v1069_v36 = vsel %vm1068_vm4, %v1880_v29, -inf }
0x1073   :  { %1070 = vmax.xlane.f32.xlu1 %v1069_v36  ;;  %v1078_v5 = vsel %vm1068_vm4, %v1884_v27, -inf }
0x1074   :  { %v1072_v47 = vsel %vm1068_vm4, %v1886_v56, -inf }
0x1076   :  { %1073 = vmax.xlane.f32.xlu0 %v1072_v47  ;;  %v1283_v19 = vpop.f32.mrb[24].mxu0 }
0x1077   :  { %1079 = vmax.xlane.f32.xlu1 %v1078_v5  ;;  %v1038_v33 = vpop.f32.mrb[25].mxu0  ;;  %v1896_v35 = vadd.f32 %v1283_v19, %v1248_v58 }
0x1078   :  { %v1894_v39 = vadd.f32 %v1248_v58, %v1038_v33  ;;  %v1284_v53 = vpop.f32.mrb[26].mxu0 }
0x1079   :  { %v1041_v20 = vpop.f32.mrb[27].mxu0  ;;  %v1902_v17 = vadd.f32 %v1284_v53, %v1248_v58  ;;  %v1087_v40 = vsel %vm1068_vm4, %v1896_v35, -inf }
0x107a   :  { %v1898_v31 = vadd.f32 %v1248_v58, %v1041_v20  ;;  %v1081_v62 = vsel %vm1068_vm4, %v1894_v39, -inf }
0x107b   :  { %1082 = vmax.xlane.f32.xlu0 %v1081_v62  ;;  %v1090_v41 = vsel %vm1068_vm4, %v1902_v17, -inf }
0x107c   :  { %v1084_v37 = vsel %vm1068_vm4, %v1898_v31, -inf }
0x107d   :  { %1085 = vmax.xlane.f32.xlu1 %v1084_v37 }
0x107f   :  { %1088 = vmax.xlane.f32.xlu0 %v1087_v40 }
0x1081   :  { %1091 = vmax.xlane.f32.xlu1 %v1090_v41 }
0x10ff   :  { %v1910_v61 = vpop.xlane.xlu0 %1076 }
0x1100   :  { %v1095_v8 = vsub.f32 %v1878_v26, %v1910_v61  ;;  %v1914_v1 = vpop.xlane.xlu1 %1070 }
0x1101   :  { %v1093_v9 = vsub.f32 %v1880_v29, %v1914_v1 }
0x1102   :  { %v1105_v10 = vmul.f32 1.442695, %v1095_v8 }
0x1103   :  { %v1101_v11 = vmul.f32 1.442695, %v1093_v9  ;;  %v1918_v14 = vpop.xlane.xlu0 %1073 }
0x1104   :  { %1406 = vpow2.f32 %v1105_v10  ;;  %v1094_v44 = vsub.f32 %v1886_v56, %v1918_v14  ;;  %v1922_v15 = vpop.xlane.xlu1 %1079 }
0x1105   :  { %v1096_v45 = vsub.f32 %v1884_v27, %v1922_v15  ;;  %1408 = vpow2.f32 %v1101_v11 }
0x1106   :  { %v1103_v57 = vmul.f32 1.442695, %v1094_v44 }
0x1107   :  { %v1107_v21 = vmul.f32 1.442695, %v1096_v45 }
0x1108   :  { %v1926_v50 = vpop.xlane.xlu0 %1082 }
0x1109   :  { %1410 = vpow2.f32 %v1107_v21  ;;  %v1097_v16 = vsub.f32 %v1894_v39, %v1926_v50 }
0x110a   :  { %v1930_v51 = vpop.xlane.xlu1 %1085  ;;  %1412 = vpow2.f32 %v1103_v57 }
0x110b   :  { %v1109_v63 = vmul.f32 1.442695, %v1097_v16  ;;  %v1098_v22 = vsub.f32 %v1898_v31, %v1930_v51 }
0x110c   :  { %v1934_v42 = vpop.xlane.xlu0 %1088 }
0x110d   :  { %1414 = vpow2.f32 %v1109_v63  ;;  %v1111_v13 = vmul.f32 1.442695, %v1098_v22  ;;  %v1099_v43 = vsub.f32 %v1896_v35, %v1934_v42 }
0x110e   :  { %v1407_v34 = vpop.eup %1406  ;;  %v1938_v46 = vpop.xlane.xlu1 %1091 }
0x110f   :  { %1416 = vpow2.f32 %v1111_v13  ;;  %v1113_v7 = vmul.f32 1.442695, %v1099_v43  ;;  %v1100_v48 = vsub.f32 %v1902_v17, %v1938_v46  ;;  %v1123_v49 = vsel %vm1068_vm4, %v1407_v34, 0.0  ;;  %v1409_v38 = vpop.eup %1408 }
0x1110   :  { %1124 = vadd.xlane.f32.xlu0 %v1123_v49  ;;  %v1117_v54 = vsel %vm1068_vm4, %v1409_v38, 0.0 }
0x1111   :  { %1418 = vpow2.f32 %v1113_v7  ;;  %v1115_v52 = vmul.f32 1.442695, %v1100_v48 }
0x1113   :  { %v1411_v18 = vpop.eup %1410  ;;  %1420 = vpow2.f32 %v1115_v52 }
0x1114   :  { %1118 = vadd.xlane.f32.xlu0 %v1117_v54  ;;  %v1126_v60 = vsel %vm1068_vm4, %v1411_v18, 0.0  ;;  %v1413_v23 = vpop.eup %1412 }
0x1115   :  { %1127 = vadd.xlane.f32.xlu1 %v1126_v60  ;;  %v1120_v55 = vsel %vm1068_vm4, %v1413_v23, 0.0 }
0x1117   :  { %v1415_v24 = vpop.eup %1414 }
0x1118   :  { %v1129_v59 = vsel %vm1068_vm4, %v1415_v24, 0.0 }
0x1119   :  { %v1417_v3 = vpop.eup %1416  ;;  %1121 = vadd.xlane.f32.xlu1 %v1120_v55  ;;  %1130 = vadd.xlane.f32.xlu0 %v1129_v59 }
0x111a   :  { %v1132_v2 = vsel %vm1068_vm4, %v1417_v3, 0.0 }
0x111b   :  { %v1419_v12 = vpop.eup %1418 }
0x111c   :  { %v1135_v4 = vsel %vm1068_vm4, %v1419_v12, 0.0 }
0x111d   :  { %v1421_v0 = vpop.eup %1420  ;;  %1133 = vadd.xlane.f32.xlu1 %v1132_v2  ;;  %1136 = vadd.xlane.f32.xlu0 %v1135_v4 }
0x111e   :  { %v1138_v58 = vsel %vm1068_vm4, %v1421_v0, 0.0 }
0x1121   :  { %1139 = vadd.xlane.f32.xlu1 %v1138_v58 }
0x119d   :  { %v1125_v25 = vpop.xlane.xlu0 %1124 }
0x119e   :  { %1422 = vlog2.f32 %v1125_v25 }
0x11a1   :  { %v1119_v28 = vpop.xlane.xlu0 %1118 }
0x11a2   :  { %1424 = vlog2.f32 %v1119_v28  ;;  %v1128_v30 = vpop.xlane.xlu1 %1127 }
0x11a3   :  { %1426 = vlog2.f32 %v1128_v30 }
0x11a6   :  { %v1122_v32 = vpop.xlane.xlu1 %1121  ;;  %v1131_v6 = vpop.xlane.xlu0 %1130 }
0x11a7   :  { %1428 = vlog2.f32 %v1122_v32 }
0x11a8   :  { %v1423_v36 = vpop.eup %1422  ;;  %1430 = vlog2.f32 %v1131_v6 }
0x11a9   :  { %v1146_v47 = vmul.f32 0.6931472, %v1423_v36 }
0x11aa   :  { %v1134_v19 = vpop.xlane.xlu1 %1133  ;;  %v1137_v5 = vpop.xlane.xlu0 %1136 }
0x11ab   :  { %v1159_v33 = vadd.f32 %v1146_v47, %v1910_v61  ;;  %1432 = vlog2.f32 %v1134_v19 }
0x11ac   :  { %v1425_v53 = vpop.eup %1424  ;;  %1434 = vlog2.f32 %v1137_v5 }
0x11ad   :  { %v1427_v20 = vpop.eup %1426  ;;  %v1167_v62 = vsub.f32 %v1878_v26, %v1159_v33  ;;  %v1142_v37 = vmul.f32 0.6931472, %v1425_v53 }
0x11ae   :  { %v1148_v40 = vmul.f32 0.6931472, %v1427_v20  ;;  %v1140_v41 = vpop.xlane.xlu1 %1139 }
0x11af   :  { %1175 = vst.msk [vmem:[%s2005_s7 + $0x10] sm:$0xff] %vm1068_vm4, %v1167_v62  ;;  %v1157_v8 = vadd.f32 %v1142_v37, %v1914_v1  ;;  %1436 = vlog2.f32 %v1140_v41 }
0x11b0   :  { %v1160_v9 = vadd.f32 %v1148_v40, %v1922_v15 }
0x11b1   :  { %v1429_v61 = vpop.eup %1428  ;;  %v1165_v10 = vsub.f32 %v1880_v29, %v1157_v8 }
0x11b2   :  { %v1431_v11 = vpop.eup %1430  ;;  %v1168_v44 = vsub.f32 %v1884_v27, %v1160_v9  ;;  %v1144_v26 = vmul.f32 0.6931472, %v1429_v61 }
0x11b3   :  { %1173 = vst.msk [vmem:[%s2005_s7] sm:$0xff] %vm1068_vm4, %v1165_v10  ;;  %v1150_v45 = vmul.f32 0.6931472, %v1431_v11 }
0x11b4   :  { %1176 = vst.msk [vmem:[%s2005_s7 + $0x18] sm:$0xff] %vm1068_vm4, %v1168_v44  ;;  %v1158_v1 = vadd.f32 %v1144_v26, %v1918_v14 }
0x11b5   :  { %v1433_v15 = vpop.eup %1432  ;;  %v1161_v29 = vadd.f32 %v1150_v45, %v1926_v50 }
0x11b6   :  { %v1435_v57 = vpop.eup %1434  ;;  %v1166_v27 = vsub.f32 %v1886_v56, %v1158_v1  ;;  %v1152_v21 = vmul.f32 0.6931472, %v1433_v15 }
0x11b7   :  { %v1169_v16 = vsub.f32 %v1894_v39, %v1161_v29  ;;  %v1154_v63 = vmul.f32 0.6931472, %v1435_v57 }
0x11b8   :  { %1174 = vst.msk [vmem:[%s2005_s7 + $0x8] sm:$0xff] %vm1068_vm4, %v1166_v27  ;;  %v1162_v22 = vadd.f32 %v1152_v21, %v1930_v51 }
0x11b9   :  { %v1437_v13 = vpop.eup %1436  ;;  %1177 = vst.msk [vmem:[%s2005_s7 + $0x20] sm:$0xff] %vm1068_vm4, %v1169_v16  ;;  %v1163_v14 = vadd.f32 %v1154_v63, %v1934_v42 }
0x11ba   :  { %v1170_v56 = vsub.f32 %v1898_v31, %v1162_v22  ;;  %v1156_v50 = vmul.f32 0.6931472, %v1437_v13 }
0x11bb   :  { %v1171_v39 = vsub.f32 %v1896_v35, %v1163_v14 }
0x11bc   :  { %1178 = vst.msk [vmem:[%s2005_s7 + $0x28] sm:$0xff] %vm1068_vm4, %v1170_v56  ;;  %v1164_v51 = vadd.f32 %v1156_v50, %v1938_v46 }
0x11bd   :  { %1179 = vst.msk [vmem:[%s2005_s7 + $0x30] sm:$0xff] %vm1068_vm4, %v1171_v39 }
0x11be   :  { %v1172_v43 = vsub.f32 %v1902_v17, %v1164_v51 }
0x11c0   :  { %1180 = vst.msk [vmem:[%s2005_s7 + $0x38] sm:$0xff] %vm1068_vm4, %v1172_v43 }

</bundles_post_ra>
